<compile_context>
chip_gen: v6e
topology: v6e:2x2x1
jax: 0.10.0
libtpu: 0.0.40
codegen_flags: <defaults>
</compile_context>

<pallas_src>
import functools

import jax
import jax.numpy as jnp
from jax.experimental import pallas as pl
from jax.experimental.pallas import tpu as pltpu

PATCH = 16          # synthetic backbone patch size
FEAT_DIM = 320      # MobileViT-xx-small pooler_output dim (fixed by the model)
FEAT_PAD = 384      # 3 x 128 lanes -> clean layout for the once-only backbone matmul
EMBED_SIZE = 32     # embed_size passed to ImageEncoderCNN.__init__
E_PAD = 128         # Linear output lanes padded 32 -> 128 for an unmasked store
MAX_TILE_P = 2048   # patch rows per grid step (bf16 tile ~3 MiB at D_in=768)


def encoder_kernel(x_ref, wf_ref, wl_ref, bl_ref, out_ref, acc_ref, *, inv_p):
    # x_ref:   (1, tp, D_in)      bf16 streamed patch rows for image b, chunk k
    # wf_ref:  (D_in, FEAT_PAD)   f32 frozen synthetic backbone weight (resident)
    # wl_ref:  (FEAT_PAD, E_PAD)  f32 nn.Linear weight (zero-padded rows/cols)
    # bl_ref:  (1, E_PAD)         f32 nn.Linear bias (zero-padded)
    # out_ref: (1, 1, E_PAD)      f32 output row for image b
    # acc_ref: (8, D_in)          f32 running row-sum of this image's patches
    k = pl.program_id(1)

    @pl.when(k == 0)
    def _():
        acc_ref[...] = jnp.zeros_like(acc_ref)

    # Pool-before-backbone: sum_rows(X) @ Wf == sum_rows(X @ Wf).
    # NOTE: only valid while the "backbone" is a pure linear map; a real
    # (nonlinear) MobileViT stack would have to return to matmul-then-pool.
    # Row-sum runs on the MXU (ones_bf16 @ X_bf16, f32 accumulation) to stay
    # off the VPU (v5e has no bf16 VALU); all 8 result sublanes carry the same
    # sum, keeping the accumulator a full (8, lane) tile.
    tp = x_ref.shape[1]
    ones = jnp.ones((8, tp), dtype=jnp.bfloat16)
    acc_ref[...] += jnp.dot(ones, x_ref[0], preferred_element_type=jnp.float32)

    @pl.when(k == pl.num_programs(1) - 1)
    def _():
        pooled = acc_ref[...] * inv_p                                   # (8, D_in)
        # (backbone) synthetic patch embedding, applied once per image
        feats = jnp.dot(pooled, wf_ref[...], preferred_element_type=jnp.float32)
        # (head) image_embeddings = Linear(pooler_output)
        out = jnp.dot(feats, wl_ref[...], preferred_element_type=jnp.float32)
        out_ref[0] = (out[0:1, :] + bl_ref[...]).astype(out_ref.dtype)


def prepare_params(w_feat, w_lin, b_lin):
    """Pad/cast the (frozen) weights once — hoisted out of the per-batch path."""
    e = w_lin.shape[1]
    wf_pad = jnp.pad(w_feat.astype(jnp.float32),
                     ((0, 0), (0, FEAT_PAD - FEAT_DIM)))
    wl_pad = jnp.pad(w_lin.astype(jnp.float32),
                     ((0, FEAT_PAD - FEAT_DIM), (0, E_PAD - e)))
    bl_pad = jnp.pad(b_lin.astype(jnp.float32), (0, E_PAD - e)).reshape(1, E_PAD)
    return wf_pad, wl_pad, bl_pad


@jax.jit
def _encode_padded(images, wf_pad, wl_pad, bl_pad):
    B, C, H, W = images.shape
    assert H % PATCH == 0 and W % PATCH == 0
    ph, pw = H // PATCH, W // PATCH
    P = ph * pw
    D_in = C * PATCH * PATCH

    # Patchify + f32->bf16 cast fused into a single HBM pass under this jit.
    x = images.reshape(B, C, ph, PATCH, pw, PATCH)
    x = x.transpose(0, 2, 4, 1, 3, 5).reshape(B, P, D_in).astype(jnp.bfloat16)

    # Patch-row tile: full extent when small, else 2048-row (8-divisible) chunks.
    tp = P if P <= MAX_TILE_P else MAX_TILE_P
    kc = pl.cdiv(P, tp)
    P_pad = kc * tp
    if P_pad != P:
        # Zero rows add nothing to the pooled sum (mean divides by the true P);
        # XLA fuses this pad into the patchify/cast pass above.
        x = jnp.pad(x, ((0, 0), (0, P_pad - P), (0, 0)))

    flops = (B * kc * 2 * 8 * tp * D_in
             + B * (2 * 8 * D_in * FEAT_PAD + 2 * 8 * FEAT_PAD * E_PAD))
    bytes_accessed = (x.size * 2 + wf_pad.size * 4 + wl_pad.size * 4
                      + bl_pad.size * 4 + B * E_PAD * 4)

    out3 = pl.pallas_call(
        functools.partial(encoder_kernel, inv_p=1.0 / float(P)),
        out_shape=jax.ShapeDtypeStruct((B, 1, E_PAD), jnp.float32),
        grid=(B, kc),
        in_specs=[
            pl.BlockSpec((1, tp, D_in), lambda b, k: (b, k, 0)),      # streamed patches
            pl.BlockSpec((D_in, FEAT_PAD), lambda b, k: (0, 0)),      # resident backbone W
            pl.BlockSpec((FEAT_PAD, E_PAD), lambda b, k: (0, 0)),     # resident Linear W
            pl.BlockSpec((1, E_PAD), lambda b, k: (0, 0)),            # resident bias
        ],
        out_specs=pl.BlockSpec((1, 1, E_PAD), lambda b, k: (b, 0, 0)),
        scratch_shapes=[pltpu.VMEM((8, D_in), jnp.float32)],
        compiler_params=pltpu.CompilerParams(
            # NOTE(v7x): "parallel" over B only keeps both TensorCores busy when
            # the per-chip batch is >= 2 (and balances only when it is even).
            dimension_semantics=("parallel", "arbitrary"),
            vmem_limit_bytes=32 * 1024 * 1024,
        ),
        cost_estimate=pl.CostEstimate(
            flops=flops, transcendentals=0, bytes_accessed=bytes_accessed),
    )(x, wf_pad, wl_pad, bl_pad)
    return out3.reshape(B, E_PAD)


def image_encoder_cnn(images, w_feat, w_lin, b_lin):
    """images: [B, C, H, W] float32 (NCHW).  Returns [B, embed_size] float32."""
    # TODO(synk): the pretrained MobileViT-xx-small stack (conv stem, inverted
    # residuals, MobileViT attention blocks) has no clean single-kernel Pallas
    # equivalent; it is replaced by a frozen synthetic linear patch embedding
    # producing the same [B, 320] pooler_output the trainable Linear consumes.
    params = prepare_params(w_feat, w_lin, b_lin)
    out = _encode_padded(images, *params)
    return out[:, : w_lin.shape[1]]


def reference(images, w_feat, w_lin, b_lin):
    """Pure-JAX reference mirroring the module: backbone -> mean pool -> Linear."""
    B, C, H, W = images.shape
    ph, pw = H // PATCH, W // PATCH
    P = ph * pw
    x = images.reshape(B, C, ph, PATCH, pw, PATCH).transpose(0, 2, 4, 1, 3, 5)
    x_patches = x.reshape(B, P, C * PATCH * PATCH)
    xb = x_patches.astype(jnp.bfloat16).astype(jnp.float32)   # match kernel input precision
    feats = jnp.einsum("bpd,df->bpf", xb, w_feat)              # [B, P, 320]
    pooled = feats.mean(axis=1)                                # pooler_output [B, 320]
    return pooled @ w_lin + b_lin[None, :]                     # [B, E]


if __name__ == "__main__":
    key = jax.random.PRNGKey(0)
    k_img, k_wf, k_wl, k_bl = jax.random.split(key, 4)

    B, C, H, W = 2, 3, 32, 32
    D_in = C * PATCH * PATCH  # 768

    images = jax.random.normal(k_img, (B, C, H, W), dtype=jnp.float32)

    # frozen synthetic backbone weights (deterministic init)
    w_feat = jax.random.normal(k_wf, (D_in, FEAT_DIM), dtype=jnp.float32) * 0.02
    # trainable Linear(320, embed_size): weight stored as [in, out], plus bias
    w_lin = jax.random.normal(k_wl, (FEAT_DIM, EMBED_SIZE), dtype=jnp.float32) * 0.05
    b_lin = jax.random.normal(k_bl, (EMBED_SIZE,), dtype=jnp.float32) * 0.01

    out = image_encoder_cnn(images, w_feat, w_lin, b_lin)
    out = jax.block_until_ready(out)

    ref = reference(images, w_feat, w_lin, b_lin)
    assert out.shape == (B, EMBED_SIZE), out.shape
    assert jnp.allclose(out, ref, atol=2e-3, rtol=2e-3), "mismatch vs reference"

    print("KERNEL_OK")
</pallas_src>

<mosaic_0001>
module attributes {stable_mosaic.version = 11 : i64} {
  func.func @encoder_kernel(%arg0: i32, %arg1: i32, %arg2: memref<1x4x768xbf16, #tpu.memory_space<vmem>>, %arg3: memref<768x384xf32, #tpu.memory_space<vmem>>, %arg4: memref<384x128xf32, #tpu.memory_space<vmem>>, %arg5: memref<1x128xf32, #tpu.memory_space<vmem>>, %arg6: memref<1x1x128xf32, #tpu.memory_space<vmem>>, %arg7: memref<8x768xf32, #tpu.memory_space<vmem>>) attributes {dimension_semantics = [#tpu.dimension_semantics<parallel>, #tpu.dimension_semantics<arbitrary>], iteration_bounds = array<i64: 2, 1>, scalar_prefetch = 0 : i64, scratch_operands = 1 : i64, tpu.core_type = #tpu.core_type<tc>, window_params = [{transform_indices = @transform_0, window_bounds = array<i64: 1, 4, 768>}, {pipeline_mode = #tpu.pipeline_mode<synchronous>, transform_indices = @transform_1, window_bounds = array<i64: 768, 384>}, {pipeline_mode = #tpu.pipeline_mode<synchronous>, transform_indices = @transform_2, window_bounds = array<i64: 384, 128>}, {pipeline_mode = #tpu.pipeline_mode<synchronous>, transform_indices = @transform_3, window_bounds = array<i64: 1, 128>}, {transform_indices = @transform_4, window_bounds = array<i64: 1, 1, 128>}]} {
    %c0_i32 = arith.constant 0 : i32
    %0 = arith.cmpi eq, %arg1, %c0_i32 : i32
    %1 = arith.extui %0 : i1 to i32
    %c0_i32_0 = arith.constant 0 : i32
    %2 = arith.cmpi ne, %1, %c0_i32_0 : i32
    scf.if %2 {
      %cst_10 = arith.constant 0.000000e+00 : f32
      %13 = vector.broadcast %cst_10 : f32 to vector<8x768xf32>
      %c0_11 = arith.constant 0 : index
      %c0_12 = arith.constant 0 : index
      %14 = vector.load %arg7[%c0_11, %c0_12] : memref<8x768xf32, #tpu.memory_space<vmem>>, vector<8x768xf32>
      tpu.vector_store %arg7[%c0_11, %c0_12], %13 {strides = array<i32>} : memref<8x768xf32, #tpu.memory_space<vmem>>, vector<8x768xf32>,
    } else {
    }
    %cst = arith.constant 1.000000e+00 : bf16
    %3 = vector.broadcast %cst : bf16 to vector<8x4xbf16>
    %c0 = arith.constant 0 : index
    %c0_1 = arith.constant 0 : index
    %4 = vector.load %arg7[%c0, %c0_1] : memref<8x768xf32, #tpu.memory_space<vmem>>, vector<8x768xf32>
    %c0_2 = arith.constant 0 : index
    %c0_3 = arith.constant 0 : index
    %c0_4 = arith.constant 0 : index
    %5 = vector.load %arg2[%c0_2, %c0_3, %c0_4] : memref<1x4x768xbf16, #tpu.memory_space<vmem>>, vector<1x4x768xbf16>
    %6 = vector.shape_cast %5 : vector<1x4x768xbf16> to vector<4x768xbf16>
    %cst_5 = arith.constant dense<0.000000e+00> : vector<8x768xf32>
    %7 = tpu.matmul %3, %6, %cst_5 {dimension_numbers = #tpu.dot_dimension_numbers<[1], [0], [0], [1], [0, 0, 1, 1], [], []>} : vector<8x4xbf16>, vector<4x768xbf16>, vector<8x768xf32> -> vector<8x768xf32>
    %8 = arith.addf %4, %7 : vector<8x768xf32>
    %c0_6 = arith.constant 0 : index
    %c0_7 = arith.constant 0 : index
    %9 = vector.load %arg7[%c0_6, %c0_7] : memref<8x768xf32, #tpu.memory_space<vmem>>, vector<8x768xf32>
    tpu.vector_store %arg7[%c0_6, %c0_7], %8 {strides = array<i32>} : memref<8x768xf32, #tpu.memory_space<vmem>>, vector<8x768xf32>,
    %c0_i32_8 = arith.constant 0 : i32
    %10 = arith.cmpi eq, %arg1, %c0_i32_8 : i32
    %11 = arith.extui %10 : i1 to i32
    %c0_i32_9 = arith.constant 0 : i32
    %12 = arith.cmpi ne, %11, %c0_i32_9 : i32
    scf.if %12 {
      %c0_10 = arith.constant 0 : index
      %c0_11 = arith.constant 0 : index
      %13 = vector.load %arg7[%c0_10, %c0_11] : memref<8x768xf32, #tpu.memory_space<vmem>>, vector<8x768xf32>
      %cst_12 = arith.constant 2.500000e-01 : f32
      %14 = vector.broadcast %cst_12 : f32 to vector<8x768xf32>
      %15 = arith.mulf %13, %14 : vector<8x768xf32>
      %c0_13 = arith.constant 0 : index
      %c0_14 = arith.constant 0 : index
      %16 = vector.load %arg3[%c0_13, %c0_14] : memref<768x384xf32, #tpu.memory_space<vmem>>, vector<768x384xf32>
      %cst_15 = arith.constant dense<0.000000e+00> : vector<8x384xf32>
      %17 = tpu.matmul %15, %16, %cst_15 {dimension_numbers = #tpu.dot_dimension_numbers<[1], [0], [0], [1], [0, 0, 1, 1], [], []>} : vector<8x768xf32>, vector<768x384xf32>, vector<8x384xf32> -> vector<8x384xf32>
      %c0_16 = arith.constant 0 : index
      %c0_17 = arith.constant 0 : index
      %18 = vector.load %arg4[%c0_16, %c0_17] : memref<384x128xf32, #tpu.memory_space<vmem>>, vector<384x128xf32>
      %cst_18 = arith.constant dense<0.000000e+00> : vector<8x128xf32>
      %19 = tpu.matmul %17, %18, %cst_18 {dimension_numbers = #tpu.dot_dimension_numbers<[1], [0], [0], [1], [0, 0, 1, 1], [], []>} : vector<8x384xf32>, vector<384x128xf32>, vector<8x128xf32> -> vector<8x128xf32>
      %20 = vector.extract_strided_slice %19 {offsets = [0, 0], sizes = [1, 128], strides = [1, 1]} : vector<8x128xf32> to vector<1x128xf32>
      %c0_19 = arith.constant 0 : index
      %c0_20 = arith.constant 0 : index
      %21 = vector.load %arg5[%c0_19, %c0_20] : memref<1x128xf32, #tpu.memory_space<vmem>>, vector<1x128xf32>
      %22 = arith.addf %20, %21 : vector<1x128xf32>
      %c0_21 = arith.constant 0 : index
      %c0_22 = arith.constant 0 : index
      %c0_23 = arith.constant 0 : index
      %23 = vector.load %arg6[%c0_21, %c0_22, %c0_23] : memref<1x1x128xf32, #tpu.memory_space<vmem>>, vector<1x1x128xf32>
      %24 = vector.shape_cast %23 : vector<1x1x128xf32> to vector<1x128xf32>
      %25 = vector.shape_cast %22 : vector<1x128xf32> to vector<1x1x128xf32>
      tpu.vector_store %arg6[%c0_21, %c0_22, %c0_23], %25 {strides = array<i32>} : memref<1x1x128xf32, #tpu.memory_space<vmem>>, vector<1x1x128xf32>,
    } else {
    }
    return
  }
  func.func @transform_0(%arg0: i32, %arg1: i32) -> (i32, i32, i32) {
    %c0_i32 = arith.constant 0 : i32
    %c0_i32_0 = arith.constant 0 : i32
    return %arg0, %arg1, %c0_i32 : i32, i32, i32
  }
  func.func @transform_1(%arg0: i32, %arg1: i32) -> (i32, i32) {
    %c0_i32 = arith.constant 0 : i32
    %c0_i32_0 = arith.constant 0 : i32
    %c0_i32_1 = arith.constant 0 : i32
    return %c0_i32, %c0_i32_0 : i32, i32
  }
  func.func @transform_2(%arg0: i32, %arg1: i32) -> (i32, i32) {
    %c0_i32 = arith.constant 0 : i32
    %c0_i32_0 = arith.constant 0 : i32
    %c0_i32_1 = arith.constant 0 : i32
    return %c0_i32, %c0_i32_0 : i32, i32
  }
  func.func @transform_3(%arg0: i32, %arg1: i32) -> (i32, i32) {
    %c0_i32 = arith.constant 0 : i32
    %c0_i32_0 = arith.constant 0 : i32
    %c0_i32_1 = arith.constant 0 : i32
    return %c0_i32, %c0_i32_0 : i32, i32
  }
  func.func @transform_4(%arg0: i32, %arg1: i32) -> (i32, i32, i32) {
    %c0_i32 = arith.constant 0 : i32
    %c0_i32_0 = arith.constant 0 : i32
    %c0_i32_1 = arith.constant 0 : i32
    return %arg0, %c0_i32, %c0_i32_0 : i32, i32, i32
  }
}

</mosaic_0001>

<bundles_post_ra>
// kernel: _encode_padded.1
= control target key start
LH: loop header
LB: loop body
LE: loop exit
PB: predicated region body
PF: predicated region fallthrough
CT: control target
= control target key end

     0   :  { %9 = vsyncpa [#allocation4], 0  ;;  %s2199_s0 = inlined_call_operand.vmem [shape: bf16[2,4,768], index: 0, kind: input, shape index: {}]   ;;  %s2200_s1 = inlined_call_operand.hbm [shape: f32[768,384], index: 1, kind: input, shape index: {}]   ;;  %s2201_s2 = inlined_call_operand.hbm [shape: f32[384,128], index: 2, kind: input, shape index: {}]   ;;  %s2202_s3 = inlined_call_operand.hbm [shape: f32[1,128], index: 3, kind: input, shape index: {}]   ;;  %s2203_s4 = inlined_call_operand.hbm [shape: f32[2,1,128], index: 4, kind: output, shape index: {}]  }
   0x1   :  { %10 = vsyncpa [#allocation7], 0 }
   0x2   :  { %11 = vsyncpa [#allocation5], 0 }
   0x3   :  { %13 = vsyncpa [#allocation5 + $0x1], 0  ;;  %s2014_s15 = smov 0   ;;  %s2016_s16 = smov 0  }
   0x4   :  { %s2018_s17 = smov 0   ;;  %s2020_s18 = smov 0  }
   0x5   :  { %s2022_s19 = smov 0   ;;  %s2024_s20 = smov 0  }
   0x6 LB: > { %s1501_s21 = sadd.s32 4294967295, %s1974_s20   ;;  %s1502_s22 = sadd.s32 4294967294, %s1974_s20   ;;  %s1974_s20 = sphi %s2024_s20, %s19_s20   ;;  %s1970_s19 = sphi %s2022_s19, %s2214_s19   ;;  %s1966_s18 = sphi %s2020_s18, %s2213_s18   ;;  %s1962_s17 = sphi %s2018_s17, %s2212_s17   ;;  %s1958_s16 = sphi %s2016_s16, %s2211_s16   ;;  %s1954_s15 = sphi %s2014_s15, %s2210_s15  }
   0x7   : > { %s31_s23 = sadd.s32 1, %s1970_s19  ;;  %s129_s24 = sadd.s32 1, %s1962_s17 }
   0x8   : > { %p33_p0 = scmp.ge.s32.totalorder %s31_s23, 2  ;;  %p139_p1 = scmp.ne.s32.totalorder %s1962_s17, %s1958_s16 }
   0x9   : > { %p140_p2 = scmp.eq.s32.totalorder %s1501_s21, 1  ;;  %p145_p3 = scmp.ne.s32.totalorder %s1958_s16, %s1954_s15 }
   0xa   : > { %s2216_s23 = smov (%p33_p0, %s31_s23), 0  ;;  %p146_p5 = scmp.eq.s32.totalorder %s1502_s22, 1 }
   0xb   : > { %p2054_p4 = por %p140_p2, %p139_p1  ;;  %s126_s26 = ssub.s32 %s1970_s19, %s2216_s23 }
   0xc   : > { %p1503_p6 = scmp.ge.s32.totalorder %s1974_s20, 1  ;;  %p127_p7 = scmp.eq.s32.totalorder %s126_s26, 0 }
   0xd   : > { %p2061_p8 = por %p146_p5, %p145_p3  ;;  %p153_p9 = scmp.lt.s32.totalorder %s1974_s20, 3 }
   0xe   : > { %s2067_s28 = scalar_select %p127_p7, %s1962_s17, %s129_s24  }
   0xf   : > { %s2205_s27 = scalar_select %p2061_p8, 1, 0 }
  0x10   : > { %p2069_p10 = pnand %p1503_p6, %p153_p9  ;;  %p2073_p11 = scmp.eq.s32.totalorder %s1501_s21, 0 }
  0x11   : > { %s1976_s5 = smov [#allocation6]   ;;  %s1977_s8 = smov [#allocation3]  }
  0x12   : > { %p1730_p12 = pneg %p2069_p10  ;;  %s178_s6 = sshll.u32 %s1976_s5, 4  ;;  %s179_s6 = int_to_ptr.vmem [resolvable:$true] %s178_s6 }
  0x13   : > { %s165_s9 = sshll.u32 %s1977_s8, 4  ;;  %s1823_s10 = scalar_lea.vmem %s179_s6, 6144  ;;  %s166_s9 = int_to_ptr.vmem [resolvable:$true] %s165_s9 }
  0x14   : > { %p2081_p13 = pnand %p2073_p11, %p1730_p12  ;;  %p1824_p1 = scmp.ne.s32.totalorder %s179_s6, %s1823_s10 }
  0x15   : > { %p1831_p5 = scmp.lt.s32.totalorder %s179_s6, %s179_s6  ;;  %p1832_p6 = scmp.lt.s32.totalorder %s1823_s10, %s1823_s10 }
  0x16   : > { %p1814_p0 = pneg %p2081_p13 }
  0x17   : > { %p1833_p7 = por %p1832_p6, %p1831_p5 }
  0x18   : > { %p1826_p2 = pnand %p1824_p1, %p1814_p0 }
  0x1a   : > { %p1827_p3 = pneg %p1826_p2 }
  0x1c   : > { %p1834_p9 = pnand %p1833_p7, %p1827_p3 }
  0x1e   : > { %1837 = shalt.err (!%p1834_p9)
}
  0x1f   : > { %s1978_s11 = smov 128   ;;  %s1979_s12 = smov 8  }
  0x20   : > { %1736 = dma.hbm_to_vmem [thread:$0]  (!%p2081_p13), %s2201_s2, 6144, %s179_s6, [#allocation7], %s1978_s11, %s1978_s11, %s1979_s12  }
  0x21   : > { %s1849_s21 = scalar_lea.vmem %s166_s9, 36864  ;;  %p1857_p8 = scmp.lt.s32.totalorder %s166_s9, %s166_s9 }
  0x22   : > { %p1850_p12 = scmp.ne.s32.totalorder %s166_s9, %s1849_s21  ;;  %p1858_p5 = scmp.lt.s32.totalorder %s1849_s21, %s1849_s21 }
  0x24   : > { %p1852_p1 = pnand %p1850_p12, %p1814_p0  ;;  %p1859_p3 = por %p1858_p5, %p1857_p8 }
  0x26   : > { %p1853_p2 = pneg %p1852_p1 }
  0x28   : > { %p1860_p6 = pnand %p1859_p3, %p1853_p2 }
  0x2a   : > { %1863 = shalt.err (!%p1860_p6)
}
  0x2b   : > { %s1980_s22 = smov 384   ;;  %s1981_s24 = smov 24  }
  0x2c   : > { %1733 = dma.hbm_to_vmem [thread:$0]  (!%p2081_p13), %s2200_s1, 36864, %s166_s9, [#allocation4], %s1980_s22, %s1980_s22, %s1981_s24  }
  0x2d   : > { %s1982_s6 = smov [#allocation8]  }
  0x2e   : > { %s192_s8 = sshll.u32 %s1982_s6, 4  ;;  %s193_s8 = int_to_ptr.vmem [resolvable:$true] %s192_s8 }
  0x2f   : > { %s1875_s10 = scalar_lea.vmem %s193_s8, 16  ;;  %s1882_s11 = scalar_lea.vmem %s193_s8, 32 }
  0x30   : > { %p1876_p7 = scmp.ne.s32.totalorder %s193_s8, %s1875_s10  ;;  %p1883_p12 = scmp.lt.s32.totalorder %s193_s8, %s193_s8 }
  0x31   : > { %p1884_p1 = scmp.lt.s32.totalorder %s1882_s11, %s1875_s10 }
  0x32   : > { %p1878_p9 = pnand %p1876_p7, %p1814_p0 }
  0x33   : > { %p1885_p2 = por %p1884_p1, %p1883_p12 }
  0x34   : > { %p1879_p8 = pneg %p1878_p9 }
  0x36   : > { %p1886_p5 = pnand %p1885_p2, %p1879_p8 }
  0x38   : > { %1889 = shalt.err (!%p1886_p5)
}
  0x39   : > { %1739 = dma.hbm_to_vmem [thread:$0]  (!%p2081_p13), %s2202_s3, 16, %s193_s8, [#allocation7]  }
  0x3a   : > { %217 = sbr.rel (%p2069_p10) target bundleno = 788 (0x314), region = 36 }
  0x3f   : > { %1941 = dma.done.wait (%p2073_p11), [#allocation4], 36864  }
  0x40   : > { %1943 = vsyncadd (%p2073_p11), [#allocation4], 4294930432 }
  0x41   : > { %1945 = dma.done.wait (%p2073_p11), [#allocation7], 6160  }
  0x42   : > { %1947 = vsyncadd (%p2073_p11), [#allocation7], 4294961136  ;;  %p254_p0 = scmp.lt.s32.totalorder %s1966_s18, 1  ;;  %v289_v0 = vlaneseq  ;;  %v1983_v1 = vmov 1983009808   ;;  %v1984_v4 = vmov 0  }
  0x43   : > { %v287_v2 = vunpack.c.l.s4 %v1983_v1  ;;  %365 = vmatprep.mubr.bf16.mxu0 %v1984_v4  ;;  %vm314_vm0 = vcmask 1041408   ;;  %v529_v8 = vld [vmem:[#allocation3 + $0x170] sm:$0xff]  ;;  %v528_v11 = vld [vmem:[#allocation3 + $0x168] sm:$0xff]  ;;  %v526_v12 = vld [vmem:[#allocation3 + $0x158] sm:$0xff]  ;;  %vm310_vm1 = vcmask 31744   ;;  %vm1987_vm2 = vmmov 0  }
  0x44   : > { %s255_s29 = scalar_select %p254_p0, %s1966_s18, 1  ;;  %v290_v3 = vshrl.u32 %v289_v0, 7  ;;  %771 = vmatprep.subr.mxu1 %v529_v8  ;;  %v525_v13 = vld [vmem:[#allocation3 + $0x150] sm:$0xff]  ;;  %v523_v14 = vld [vmem:[#allocation3 + $0x140] sm:$0xff]  ;;  %v522_v18 = vld [vmem:[#allocation3 + $0x138] sm:$0xff] }
  0x45   : > { %v288_v5 = vunpack.c.0.s8 %v287_v2  ;;  %772 = vmatpush1.msra.mxu1 %v528_v11  ;;  %v520_v20 = vld [vmem:[#allocation3 + $0x128] sm:$0xff]  ;;  %v519_v22 = vld [vmem:[#allocation3 + $0x120] sm:$0xff]  ;;  %v517_v23 = vld [vmem:[#allocation3 + $0x110] sm:$0xff]  ;;  %v1985_v27 = vmov 1065369472   ;;  %s252_s30 = sand.u32 1, %s1958_s16  }
  0x46   : > { %s1715_s7 = smul.u32 12, %s255_s29  ;;  %773 = vmatprep.subr.mxu1 %v526_v12  ;;  %v516_v26 = vld [vmem:[#allocation3 + $0x108] sm:$0xff]  ;;  %v514_v28 = vld [vmem:[#allocation3 + $0xf8] sm:$0xff]  ;;  %v513_v29 = vld [vmem:[#allocation3 + $0xf0] sm:$0xff]  ;;  %s1520_s22 = sshll.u32 %s1966_s18, 4 }
  0x47   : > { %v291_v6 = vsub.s32 %v288_v5, %v290_v3  ;;  %774 = vmatpush1.msra.mxu1 %v525_v13  ;;  %v511_v30 = vld [vmem:[#allocation3 + $0xe0] sm:$0xff]  ;;  %v510_v31 = vld [vmem:[#allocation3 + $0xd8] sm:$0xff]  ;;  %v508_v32 = vld [vmem:[#allocation3 + $0xc8] sm:$0xff]  ;;  %s253_s24 = scalar_lea.vmem [#allocation9], %s252_s30  ;;  %s1396_s8 = scalar_lea.hbm %s2203_s4, %s1520_s22 }
  0x48   : > { %s262_s21 = scalar_lea.vmem %s2199_s0, %s1715_s7  ;;  %775 = vmatprep.subr.mxu1 %v523_v14  ;;  %v507_v33 = vld [vmem:[#allocation3 + $0xc0] sm:$0xff]  ;;  %v625_v35 = vld [vmem:[#allocation3 + $0x470] sm:$0xff]  ;;  %v504_v37 = vld [vmem:[#allocation3 + $0xa8] sm:$0xff]  ;;  %s1398_s26 = sshll.u32 %s253_s24, 4  ;;  %s1399_s26 = int_to_ptr.vmem [resolvable:$true] %s1398_s26 }
  0x49   : > { %v281_v7 = vld [vmem:[%s262_s21] sm:$0xff]  ;;  %v1513_v19 = vld.sshfl [vmem:[%s262_s21 + $0x8] sm:$0x33 pattern:$0x76325410]  ;;  %776 = vmatpush1.msra.mxu1 %v522_v18  ;;  %v505_v36 = vld [vmem:[#allocation3 + $0xb0] sm:$0xff] }
  0x4a   : > { %v285_v9 = vcombine.high %v281_v7, %v281_v7  ;;  %v292_v10 = vrot.slane %v281_v7, %v291_v6  ;;  %v309_v25 = vcombine.high %v1513_v19, %v1513_v19  ;;  %777 = vmatprep.subr.mxu1 %v520_v20  ;;  %v328_v34 = vsel %vm314_vm0, %v1513_v19, 0  ;;  %v502_v38 = vld [vmem:[#allocation3 + $0x98] sm:$0xff]  ;;  %v501_v39 = vld [vmem:[#allocation3 + $0x90] sm:$0xff]  ;;  %v499_v40 = vld [vmem:[#allocation3 + $0x80] sm:$0xff]  ;;  %s1386_s10 = scalar_lea.sflag [#allocation5], %s252_s30  ;;  %s1890_s11 = scalar_lea.vmem %s1399_s26, 16 }
  0x4b   : > { %778 = vmatpush1.msra.mxu1 %v519_v22  ;;  %v498_v41 = vld [vmem:[#allocation3 + $0x78] sm:$0xff]  ;;  %v496_v42 = vld [vmem:[#allocation3 + $0x68] sm:$0xff]  ;;  %v495_v44 = vld [vmem:[#allocation3 + $0x60] sm:$0xff]  ;;  %p1891_p10 = scmp.ne.s32.totalorder %s1399_s26, %s1890_s11  ;;  %s1988_s12 = smov [#allocation9]  }
  0x4c   : > { %v299_v15 = vrot.slane %v285_v9, %v291_v6  ;;  %v300_v16 = vcombine.high %v292_v10, %v292_v10  ;;  %v316_v17 = vsel %vm314_vm0, %v292_v10, 0  ;;  %779 = vmatprep.subr.mxu1 %v517_v23  ;;  %v624_v43 = vld [vmem:[#allocation3 + $0x468] sm:$0xff]  ;;  %v622_v45 = vld [vmem:[#allocation3 + $0x458] sm:$0xff]  ;;  %v493_v46 = vld [vmem:[#allocation3 + $0x50] sm:$0xff]  ;;  %s1894_s13 = sshll.u32 %s1988_s12, 4  ;;  %s1895_s13 = int_to_ptr.vmem [resolvable:$false] %s1894_s13 }
  0x4d   : > { %780 = vmatpush1.msra.mxu1 %v516_v26  ;;  %v621_v47 = vld [vmem:[#allocation3 + $0x450] sm:$0xff]  ;;  %v492_v48 = vld [vmem:[#allocation3 + $0x48] sm:$0xff]  ;;  %v619_v49 = vld [vmem:[#allocation3 + $0x440] sm:$0xff]  ;;  %p1892_p11 = pnand %p1891_p10, %p2054_p4  ;;  %s1896_s18 = scalar_lea.vmem %s1895_s13, 32 }
  0x4e   : > { %1514 = vmatprep.subr.msk.bf16.mxu0 %vm314_vm0, %v300_v16  ;;  %v301_v21 = vcombine.high %v299_v15, %v299_v15  ;;  %v322_v24 = vsel %vm314_vm0, %v299_v15, 0  ;;  %781 = vmatprep.subr.mxu1 %v514_v28  ;;  %v490_v50 = vld [vmem:[#allocation3 + $0x38] sm:$0xff]  ;;  %v489_v52 = vld [vmem:[#allocation3 + $0x30] sm:$0xff]  ;;  %v616_v53 = vld [vmem:[#allocation3 + $0x428] sm:$0xff]  ;;  %p1897_p3 = scmp.lt.s32.totalorder %s1399_s26, %s1895_s13  ;;  %p1898_p6 = scmp.lt.s32.totalorder %s1896_s18, %s1890_s11 }
  0x4f   : > { %348 = vmatpush1.bf16.msra.mxu0 %v316_v17  ;;  %782 = vmatpush1.msra.mxu1 %v513_v29  ;;  %v618_v51 = vld [vmem:[#allocation3 + $0x438] sm:$0xff]  ;;  %v487_v54 = vld [vmem:[#allocation3 + $0x20] sm:$0xff]  ;;  %v613_v57 = vld [vmem:[#allocation3 + $0x410] sm:$0xff]  ;;  %p1893_p13 = pneg %p1892_p11 }
  0x50   : > { %1516 = vmatprep.subr.msk.bf16.mxu0 %vm314_vm0, %v301_v21  ;;  %783 = vmatprep.subr.mxu1 %v511_v30  ;;  %v615_v55 = vld [vmem:[#allocation3 + $0x420] sm:$0xff]  ;;  %v486_v56 = vld [vmem:[#allocation3 + $0x18] sm:$0xff]  ;;  %v484_v58 = vld [vmem:[#allocation3 + $0x8] sm:$0xff]  ;;  %p1899_p7 = por %p1898_p6, %p1897_p3 }
  0x51   : > { %784 = vmatpush1.msra.mxu1 %v510_v31  ;;  %v612_v59 = vld [vmem:[#allocation3 + $0x408] sm:$0xff]  ;;  %v483_v60 = vld [vmem:[#allocation3] sm:$0xff]  ;;  %v610_v61 = vld [vmem:[#allocation3 + $0x3f8] sm:$0xff] }
  0x52   : > { %1515 = vmatmul.mubr.msk.bf16.vlgmr.msra.gmra.mxu0 %vm310_vm1, %v1985_v27  ;;  %785 = vmatprep.subr.mxu1 %v508_v32  ;;  %v577_v62 = vld [vmem:[#allocation3 + $0x2f0] sm:$0xff]  ;;  %v576_v0 = vld [vmem:[#allocation3 + $0x2e8] sm:$0xff]  ;;  %v607_v1 = vld [vmem:[#allocation3 + $0x3e0] sm:$0xff]  ;;  %p1900_p9 = pnand %p1899_p7, %p1893_p13 }
  0x53   : > { %389 = vmatpush1.bf16.msra.mxu0 %v322_v24  ;;  %406 = vmatprep.mubr.bf16.mxu0 %v1984_v4  ;;  %v609_v63 = vld [vmem:[#allocation3 + $0x3f0] sm:$0xff]  ;;  %v574_v2 = vld [vmem:[#allocation3 + $0x2d8] sm:$0xff]  ;;  %v604_v5 = vld [vmem:[#allocation3 + $0x3c8] sm:$0xff] }
  0x54   : > { %1518 = vmatprep.subr.msk.bf16.mxu0 %vm314_vm0, %v309_v25  ;;  %786 = vmatpush1.msra.mxu1 %v507_v33  ;;  %v606_v3 = vld [vmem:[#allocation3 + $0x3d8] sm:$0xff]  ;;  %v571_v6 = vld [vmem:[#allocation3 + $0x2c0] sm:$0xff]  ;;  %v601_v9 = vld [vmem:[#allocation3 + $0x3b0] sm:$0xff] }
  0x55   : > { %787 = vmatprep.subr.mxu1 %v505_v36  ;;  %v603_v7 = vld [vmem:[#allocation3 + $0x3c0] sm:$0xff]  ;;  %v570_v8 = vld [vmem:[#allocation3 + $0x2b8] sm:$0xff]  ;;  %v568_v10 = vld [vmem:[#allocation3 + $0x2a8] sm:$0xff] }
  0x56   : > { %788 = vmatpush1.msra.mxu1 %v504_v37  ;;  %v600_v11 = vld [vmem:[#allocation3 + $0x3a8] sm:$0xff]  ;;  %v567_v12 = vld [vmem:[#allocation3 + $0x2a0] sm:$0xff]  ;;  %v598_v13 = vld [vmem:[#allocation3 + $0x398] sm:$0xff] }
  0x57   : > { %789 = vmatprep.subr.mxu1 %v502_v38  ;;  %v565_v14 = vld [vmem:[#allocation3 + $0x290] sm:$0xff]  ;;  %v564_v16 = vld [vmem:[#allocation3 + $0x288] sm:$0xff]  ;;  %v595_v17 = vld [vmem:[#allocation3 + $0x380] sm:$0xff] }
  0x58   : > { %790 = vmatpush1.msra.mxu1 %v501_v39  ;;  %v597_v15 = vld [vmem:[#allocation3 + $0x390] sm:$0xff]  ;;  %v562_v18 = vld [vmem:[#allocation3 + $0x278] sm:$0xff]  ;;  %v592_v21 = vld [vmem:[#allocation3 + $0x368] sm:$0xff] }
  0x59   : > { %791 = vmatprep.subr.mxu1 %v499_v40  ;;  %v594_v19 = vld [vmem:[#allocation3 + $0x378] sm:$0xff]  ;;  %v561_v20 = vld [vmem:[#allocation3 + $0x270] sm:$0xff]  ;;  %v559_v22 = vld [vmem:[#allocation3 + $0x260] sm:$0xff] }
  0x5a   : > { %1517 = vmatmul.mubr.msk.bf16.vlgmr.msra.gmra.mxu0 %vm310_vm1, %v1985_v27  ;;  %792 = vmatpush1.msra.mxu1 %v498_v41  ;;  %v591_v23 = vld [vmem:[#allocation3 + $0x360] sm:$0xff]  ;;  %v558_v24 = vld [vmem:[#allocation3 + $0x258] sm:$0xff]  ;;  %v589_v25 = vld [vmem:[#allocation3 + $0x350] sm:$0xff] }
  0x5b   : > { %430 = vmatpush1.bf16.msra.mxu0 %v328_v34  ;;  %447 = vmatprep.mubr.bf16.mxu0 %v1984_v4  ;;  %v573_v4 = vld [vmem:[#allocation3 + $0x2d0] sm:$0xff]  ;;  %v556_v26 = vld [vmem:[#allocation3 + $0x248] sm:$0xff]  ;;  %v555_v28 = vld [vmem:[#allocation3 + $0x240] sm:$0xff] }
  0x5c   : > { %842 = vmatprep.subr.mxu0 %v625_v35  ;;  %793 = vmatprep.subr.mxu1 %v496_v42  ;;  %v586_v29 = vld [vmem:[#allocation3 + $0x338] sm:$0xff]  ;;  %v553_v30 = vld [vmem:[#allocation3 + $0x230] sm:$0xff]  ;;  %v552_v32 = vld [vmem:[#allocation3 + $0x228] sm:$0xff] }
  0x5d   : > { %794 = vmatpush1.msra.mxu1 %v495_v44  ;;  %v585_v31 = vld [vmem:[#allocation3 + $0x330] sm:$0xff]  ;;  %v583_v33 = vld [vmem:[#allocation3 + $0x320] sm:$0xff]  ;;  %v550_v34 = vld [vmem:[#allocation3 + $0x218] sm:$0xff] }
  0x5e   : > { %795 = vmatprep.subr.mxu1 %v493_v46  ;;  %v582_v35 = vld [vmem:[#allocation3 + $0x318] sm:$0xff]  ;;  %v549_v36 = vld [vmem:[#allocation3 + $0x210] sm:$0xff]  ;;  %v580_v37 = vld [vmem:[#allocation3 + $0x308] sm:$0xff] }
  0x5f   : > { %796 = vmatpush1.msra.mxu1 %v492_v48  ;;  %v547_v38 = vld [vmem:[#allocation3 + $0x200] sm:$0xff]  ;;  %v546_v40 = vld [vmem:[#allocation3 + $0x1f8] sm:$0xff]  ;;  %v673_v41 = vld [vmem:[#allocation3 + $0x5f0] sm:$0xff] }
  0x60   : > { %797 = vmatprep.subr.mxu1 %v490_v50  ;;  %v579_v39 = vld [vmem:[#allocation3 + $0x300] sm:$0xff]  ;;  %v544_v42 = vld [vmem:[#allocation3 + $0x1e8] sm:$0xff]  ;;  %v541_v46 = vld [vmem:[#allocation3 + $0x1d0] sm:$0xff] }
  0x61   : > { %798 = vmatpush1.msra.mxu1 %v489_v52  ;;  %v543_v44 = vld [vmem:[#allocation3 + $0x1e0] sm:$0xff]  ;;  %v540_v48 = vld [vmem:[#allocation3 + $0x1c8] sm:$0xff]  ;;  %v538_v50 = vld [vmem:[#allocation3 + $0x1b8] sm:$0xff] }
  0x62   : > { %1519 = vmatmul.mubr.msk.bf16.vlgmr.msra.gmra.mxu0 %vm310_vm1, %v1985_v27  ;;  %799 = vmatprep.subr.mxu1 %v487_v54  ;;  %v588_v27 = vld [vmem:[#allocation3 + $0x348] sm:$0xff]  ;;  %v661_v54 = vld [vmem:[#allocation3 + $0x590] sm:$0xff] }
  0x63   : > { %843 = vmatpush1.msra.mxu0 %v624_v43  ;;  %800 = vmatpush1.msra.mxu1 %v486_v56  ;;  %v672_v43 = vld [vmem:[#allocation3 + $0x5e8] sm:$0xff]  ;;  %v658_v56 = vld [vmem:[#allocation3 + $0x578] sm:$0xff] }
  0x64   : > { %844 = vmatprep.subr.mxu0 %v622_v45  ;;  %801 = vmatprep.subr.mxu1 %v484_v58  ;;  %v670_v45 = vld [vmem:[#allocation3 + $0x5d8] sm:$0xff]  ;;  %v664_v52 = vld [vmem:[#allocation3 + $0x5a8] sm:$0xff]  ;;  %v655_v58 = vld [vmem:[#allocation3 + $0x560] sm:$0xff] }
  0x65   : > { %845 = vmatpush1.msra.mxu0 %v621_v47  ;;  %802 = vmatpush1.msra.mxu1 %v483_v60  ;;  %v669_v47 = vld [vmem:[#allocation3 + $0x5d0] sm:$0xff]  ;;  %v652_v60 = vld [vmem:[#allocation3 + $0x548] sm:$0xff] }
  0x66   : > { %846 = vmatprep.subr.mxu0 %v619_v49  ;;  %803 = vmatprep.subr.mxu1 %v577_v62  ;;  %v667_v49 = vld [vmem:[#allocation3 + $0x5c0] sm:$0xff]  ;;  %v649_v62 = vld [vmem:[#allocation3 + $0x530] sm:$0xff] }
  0x67   : > { %847 = vmatpush1.msra.mxu0 %v618_v51  ;;  %804 = vmatpush2.msra.mxu1 %v576_v0  ;;  %v666_v51 = vld [vmem:[#allocation3 + $0x5b8] sm:$0xff] }
  0x68   : > { %848 = vmatprep.subr.mxu0 %v616_v53  ;;  %805 = vmatprep.subr.mxu1 %v574_v2  ;;  %v663_v53 = vld [vmem:[#allocation3 + $0x5a0] sm:$0xff]  ;;  %v646_v0 = vld [vmem:[#allocation3 + $0x518] sm:$0xff]  ;;  %v645_v2 = vld [vmem:[#allocation3 + $0x510] sm:$0xff] }
  0x69   : > { %849 = vmatpush1.msra.mxu0 %v615_v55  ;;  %806 = vmatpush2.msra.mxu1 %v573_v4  ;;  %v660_v55 = vld [vmem:[#allocation3 + $0x588] sm:$0xff]  ;;  %v643_v4 = vld [vmem:[#allocation3 + $0x500] sm:$0xff] }
  0x6a   : > { %850 = vmatprep.subr.mxu0 %v613_v57  ;;  %807 = vmatprep.subr.mxu1 %v571_v6  ;;  %v657_v57 = vld [vmem:[#allocation3 + $0x570] sm:$0xff]  ;;  %v642_v6 = vld [vmem:[#allocation3 + $0x4f8] sm:$0xff] }
  0x6b   : > { %851 = vmatpush1.msra.mxu0 %v612_v59  ;;  %808 = vmatpush2.msra.mxu1 %v570_v8  ;;  %v654_v59 = vld [vmem:[#allocation3 + $0x558] sm:$0xff]  ;;  %v640_v8 = vld [vmem:[#allocation3 + $0x4e8] sm:$0xff] }
  0x6c   : > { %852 = vmatprep.subr.mxu0 %v610_v61  ;;  %809 = vmatprep.subr.mxu1 %v568_v10  ;;  %v651_v61 = vld [vmem:[#allocation3 + $0x540] sm:$0xff] }
  0x6d   : > { %853 = vmatpush1.msra.mxu0 %v609_v63  ;;  %810 = vmatpush2.msra.mxu1 %v567_v12  ;;  %v648_v63 = vld [vmem:[#allocation3 + $0x528] sm:$0xff]  ;;  %v639_v10 = vld [vmem:[#allocation3 + $0x4e0] sm:$0xff]  ;;  %v637_v12 = vld [vmem:[#allocation3 + $0x4d0] sm:$0xff] }
  0x6e   : > { %854 = vmatprep.subr.mxu0 %v607_v1  ;;  %811 = vmatprep.subr.mxu1 %v565_v14  ;;  %v537_v1 = vld [vmem:[#allocation3 + $0x1b0] sm:$0xff]  ;;  %v634_v14 = vld [vmem:[#allocation3 + $0x4b8] sm:$0xff] }
  0x6f   : > { %855 = vmatpush1.msra.mxu0 %v606_v3  ;;  %812 = vmatpush2.msra.mxu1 %v564_v16  ;;  %v535_v3 = vld [vmem:[#allocation3 + $0x1a0] sm:$0xff] }
  0x70   : > { %856 = vmatprep.subr.mxu0 %v604_v5  ;;  %813 = vmatprep.subr.mxu1 %v562_v18  ;;  %v534_v5 = vld [vmem:[#allocation3 + $0x198] sm:$0xff]  ;;  %v631_v16 = vld [vmem:[#allocation3 + $0x4a0] sm:$0xff]  ;;  %v628_v18 = vld [vmem:[#allocation3 + $0x488] sm:$0xff] }
  0x71   : > { %857 = vmatpush1.msra.mxu0 %v603_v7  ;;  %814 = vmatpush2.msra.mxu1 %v561_v20  ;;  %v532_v7 = vld [vmem:[#allocation3 + $0x188] sm:$0xff]  ;;  %v578_v20 = vld [vmem:[#allocation3 + $0x2f8] sm:$0xff] }
  0x72   : > { %858 = vmatprep.subr.mxu0 %v601_v9  ;;  %815 = vmatprep.subr.mxu1 %v559_v22  ;;  %v531_v9 = vld [vmem:[#allocation3 + $0x180] sm:$0xff] }
  0x73   : > { %859 = vmatpush1.msra.mxu0 %v600_v11  ;;  %816 = vmatpush2.msra.mxu1 %v558_v24  ;;  %v721_v11 = vld [vmem:[#allocation3 + $0x770] sm:$0xff] }
  0x74   : > { %860 = vmatprep.subr.mxu0 %v598_v13  ;;  %817 = vmatprep.subr.mxu1 %v556_v26  ;;  %v636_v13 = vld [vmem:[#allocation3 + $0x4c8] sm:$0xff] }
  0x75   : > { %861 = vmatpush1.msra.mxu0 %v597_v15  ;;  %818 = vmatpush2.msra.mxu1 %v555_v28  ;;  %v633_v15 = vld [vmem:[#allocation3 + $0x4b0] sm:$0xff]  ;;  %v720_v26 = vld [vmem:[#allocation3 + $0x768] sm:$0xff] }
  0x76   : > { %862 = vmatprep.subr.mxu0 %v595_v17  ;;  %819 = vmatprep.subr.mxu1 %v553_v30  ;;  %v630_v17 = vld [vmem:[#allocation3 + $0x498] sm:$0xff]  ;;  %v715_v30 = vld [vmem:[#allocation3 + $0x740] sm:$0xff] }
  0x77   : > { %863 = vmatpush1.msra.mxu0 %v594_v19  ;;  %820 = vmatpush2.msra.mxu1 %v552_v32  ;;  %v627_v19 = vld [vmem:[#allocation3 + $0x480] sm:$0xff]  ;;  %v714_v32 = vld [vmem:[#allocation3 + $0x738] sm:$0xff] }
  0x78   : > { %864 = vmatprep.subr.mxu0 %v592_v21  ;;  %821 = vmatprep.subr.mxu1 %v550_v34 }
  0x79   : > { %865 = vmatpush1.msra.mxu0 %v591_v23  ;;  %822 = vmatpush2.msra.mxu1 %v549_v36  ;;  %v711_v36 = vld [vmem:[#allocation3 + $0x720] sm:$0xff] }
  0x7a   : > { %866 = vmatprep.subr.mxu0 %v589_v25  ;;  %823 = vmatprep.subr.mxu1 %v547_v38  ;;  %v709_v38 = vld [vmem:[#allocation3 + $0x710] sm:$0xff] }
  0x7b   : > { %867 = vmatpush1.msra.mxu0 %v588_v27  ;;  %824 = vmatpush2.msra.mxu1 %v546_v40  ;;  %v718_v27 = vld [vmem:[#allocation3 + $0x758] sm:$0xff] }
  0x7c   : > { %868 = vmatprep.subr.mxu0 %v586_v29  ;;  %825 = vmatprep.subr.mxu1 %v544_v42  ;;  %v717_v29 = vld [vmem:[#allocation3 + $0x750] sm:$0xff]  ;;  %v530_v40 = vld [vmem:[#allocation3 + $0x178] sm:$0xff] }
  0x7d   : > { %869 = vmatpush1.msra.mxu0 %v585_v31  ;;  %826 = vmatpush2.msra.mxu1 %v543_v44  ;;  %v706_v42 = vld [vmem:[#allocation3 + $0x6f8] sm:$0xff]  ;;  %v705_v44 = vld [vmem:[#allocation3 + $0x6f0] sm:$0xff] }
  0x7e   : > { %870 = vmatprep.subr.mxu0 %v583_v33  ;;  %827 = vmatprep.subr.mxu1 %v541_v46  ;;  %v712_v33 = vld [vmem:[#allocation3 + $0x728] sm:$0xff]  ;;  %v527_v46 = vld [vmem:[#allocation3 + $0x160] sm:$0xff] }
  0x7f   : > { %871 = vmatpush1.msra.mxu0 %v582_v35  ;;  %828 = vmatpush2.msra.mxu1 %v540_v48  ;;  %v572_v48 = vld [vmem:[#allocation3 + $0x2c8] sm:$0xff] }
  0x80   : > { %872 = vmatprep.subr.mxu0 %v580_v37  ;;  %829 = vmatprep.subr.mxu1 %v538_v50 }
  0x81   : > { %873 = vmatpush1.msra.mxu0 %v579_v39  ;;  %830 = vmatpush2.msra.mxu1 %v537_v1  ;;  %v708_v39 = vld [vmem:[#allocation3 + $0x708] sm:$0xff] }
  0x82   : > { %874 = vmatprep.subr.mxu0 %v673_v41  ;;  %831 = vmatprep.subr.mxu1 %v535_v3  ;;  %v691_v3 = vld [vmem:[#allocation3 + $0x680] sm:$0xff] }
  0x83   : > { %875 = vmatpush2.msra.mxu0 %v672_v43  ;;  %832 = vmatpush2.msra.mxu1 %v534_v5  ;;  %v575_v43 = vld [vmem:[#allocation3 + $0x2e0] sm:$0xff]  ;;  %v690_v5 = vld [vmem:[#allocation3 + $0x678] sm:$0xff] }
  0x84   : > { %876 = vmatprep.subr.mxu0 %v670_v45  ;;  %833 = vmatprep.subr.mxu1 %v532_v7  ;;  %v688_v7 = vld [vmem:[#allocation3 + $0x668] sm:$0xff] }
  0x85   : > { %877 = vmatpush2.msra.mxu0 %v669_v47  ;;  %834 = vmatpush2.msra.mxu1 %v531_v9  ;;  %v703_v47 = vld [vmem:[#allocation3 + $0x6e0] sm:$0xff] }
  0x86   : > { %878 = vmatprep.subr.mxu0 %v667_v49  ;;  %913 = vmatprep.subr.mxu1 %v721_v11  ;;  %v702_v49 = vld [vmem:[#allocation3 + $0x6d8] sm:$0xff]  ;;  %v687_v9 = vld [vmem:[#allocation3 + $0x660] sm:$0xff]  ;;  %v685_v11 = vld [vmem:[#allocation3 + $0x650] sm:$0xff] }
  0x87   : > { %879 = vmatpush2.msra.mxu0 %v666_v51  ;;  %v524_v51 = vld [vmem:[#allocation3 + $0x148] sm:$0xff] }
  0x88   : > { %880 = vmatprep.subr.mxu0 %v664_v52  ;;  %v700_v52 = vld [vmem:[#allocation3 + $0x6c8] sm:$0xff] }
  0x89   : > { %881 = vmatpush2.msra.mxu0 %v663_v53  ;;  %v569_v53 = vld [vmem:[#allocation3 + $0x2b0] sm:$0xff] }
  0x8a   : > { %882 = vmatprep.subr.mxu0 %v661_v54  ;;  %v699_v54 = vld [vmem:[#allocation3 + $0x6c0] sm:$0xff] }
  0x8b   : > { %883 = vmatpush2.msra.mxu0 %v660_v55 }
  0x8c   : > { %884 = vmatprep.subr.mxu0 %v658_v56  ;;  %v521_v56 = vld [vmem:[#allocation3 + $0x130] sm:$0xff] }
  0x8d   : > { %885 = vmatpush2.msra.mxu0 %v657_v57  ;;  %v697_v57 = vld [vmem:[#allocation3 + $0x6b0] sm:$0xff] }
  0x8e   : > { %886 = vmatprep.subr.mxu0 %v655_v58  ;;  %v566_v58 = vld [vmem:[#allocation3 + $0x298] sm:$0xff] }
  0x8f   : > { %887 = vmatpush2.msra.mxu0 %v654_v59  ;;  %v696_v59 = vld [vmem:[#allocation3 + $0x6a8] sm:$0xff] }
  0x90   : > { %888 = vmatprep.subr.mxu0 %v652_v60 }
  0x91   : > { %889 = vmatpush2.msra.mxu0 %v651_v61  ;;  %v518_v61 = vld [vmem:[#allocation3 + $0x118] sm:$0xff] }
  0x92   : > { %890 = vmatprep.subr.mxu0 %v649_v62  ;;  %v694_v62 = vld [vmem:[#allocation3 + $0x698] sm:$0xff] }
  0x93   : > { %891 = vmatpush2.msra.mxu0 %v648_v63  ;;  %v563_v63 = vld [vmem:[#allocation3 + $0x280] sm:$0xff] }
  0x94   : > { %892 = vmatprep.subr.mxu0 %v646_v0  ;;  %v693_v0 = vld [vmem:[#allocation3 + $0x690] sm:$0xff] }
  0x95   : > { %893 = vmatpush2.msra.mxu0 %v645_v2  ;;  %v515_v2 = vld [vmem:[#allocation3 + $0x100] sm:$0xff] }
  0x96   : > { %894 = vmatprep.subr.mxu0 %v643_v4  ;;  %v560_v4 = vld [vmem:[#allocation3 + $0x268] sm:$0xff] }
  0x97   : > { %895 = vmatpush2.msra.mxu0 %v642_v6  ;;  %v512_v6 = vld [vmem:[#allocation3 + $0xe8] sm:$0xff] }
  0x98   : > { %896 = vmatprep.subr.mxu0 %v640_v8  ;;  %v557_v8 = vld [vmem:[#allocation3 + $0x250] sm:$0xff] }
  0x99   : > { %897 = vmatpush2.msra.mxu0 %v639_v10  ;;  %v509_v10 = vld [vmem:[#allocation3 + $0xd0] sm:$0xff] }
  0x9a   : > { %898 = vmatprep.subr.mxu0 %v637_v12  ;;  %v554_v12 = vld [vmem:[#allocation3 + $0x238] sm:$0xff] }
  0x9b   : > { %899 = vmatpush2.msra.mxu0 %v636_v13  ;;  %v684_v13 = vld [vmem:[#allocation3 + $0x648] sm:$0xff] }
  0x9c   : > { %900 = vmatprep.subr.mxu0 %v634_v14  ;;  %v506_v14 = vld [vmem:[#allocation3 + $0xb8] sm:$0xff] }
  0x9d   : > { %901 = vmatpush2.msra.mxu0 %v633_v15  ;;  %v682_v15 = vld [vmem:[#allocation3 + $0x638] sm:$0xff] }
  0x9e   : > { %902 = vmatprep.subr.mxu0 %v631_v16  ;;  %v551_v16 = vld [vmem:[#allocation3 + $0x220] sm:$0xff] }
  0x9f   : > { %903 = vmatpush2.msra.mxu0 %v630_v17  ;;  %v681_v17 = vld [vmem:[#allocation3 + $0x630] sm:$0xff] }
  0xa0   : > { %904 = vmatprep.subr.mxu0 %v628_v18  ;;  %v503_v18 = vld [vmem:[#allocation3 + $0xa0] sm:$0xff] }
  0xa1   : > { %905 = vmatpush2.msra.mxu0 %v627_v19  ;;  %v679_v19 = vld [vmem:[#allocation3 + $0x620] sm:$0xff] }
  0xa2   : > { %1523 = vmatprep.subr.mxu0 %v578_v20  ;;  %v548_v20 = vld [vmem:[#allocation3 + $0x208] sm:$0xff] }
 0x112   : > { %v367_v21 = vpop.f32.mrf.mxu0 }
 0x113   : > { %v2138_v24 = vmul.f32 0.25, %v367_v21  ;;  %v678_v21 = vld [vmem:[#allocation3 + $0x618] sm:$0xff] }
 0x114   : > { %v369_v22 = vpop.f32.mrf.mxu0 }
 0x115   : > { %v478_v23 = vmul.f32 0.25, %v369_v22  ;;  %v500_v22 = vld [vmem:[#allocation3 + $0x88] sm:$0xff] }
 0x116   : > { %v371_v25 = vpop.f32.mrf.mxu0 }
 0x117   : > { %835 = vmatprep.mubr.f32.mxu1 %v478_v23  ;;  %v545_v25 = vld [vmem:[#allocation3 + $0x1f0] sm:$0xff] }
 0x118   : > { %v372_v28 = vpop.f32.mrf.mxu0  ;;  %836 = vmatmul.mubr.f32.vlgmr.msra.gmra.mxu1 %v2138_v24 }
 0x119   : > { %914 = vmatpush1.msra.mxu1 %v720_v26  ;;  %v675_v26 = vld [vmem:[#allocation3 + $0x600] sm:$0xff]  ;;  %v769_v28 = vld [vmem:[#allocation3 + $0x8f0] sm:$0xff] }
 0x11a   : > { %915 = vmatprep.subr.mxu1 %v718_v27  ;;  %v408_v31 = vpop.f32.mrf.mxu0  ;;  %v497_v27 = vld [vmem:[#allocation3 + $0x70] sm:$0xff] }
 0x11b   : > { %916 = vmatpush1.msra.mxu1 %v717_v29  ;;  %v2141_v34 = vmul.f32 0.25, %v408_v31  ;;  %v542_v29 = vld [vmem:[#allocation3 + $0x1d8] sm:$0xff] }
 0x11c   : > { %917 = vmatprep.subr.mxu1 %v715_v30  ;;  %v410_v35 = vpop.f32.mrf.mxu0  ;;  %v768_v30 = vld [vmem:[#allocation3 + $0x8e8] sm:$0xff]  ;;  %v494_v31 = vld [vmem:[#allocation3 + $0x58] sm:$0xff] }
 0x11d   : > { %v2143_v37 = vmul.f32 0.25, %v410_v35  ;;  %918 = vmatpush1.msra.mxu1 %v714_v32  ;;  %v766_v32 = vld [vmem:[#allocation3 + $0x8d8] sm:$0xff]  ;;  %v765_v35 = vld [vmem:[#allocation3 + $0x8d0] sm:$0xff] }
 0x11e   : > { %919 = vmatprep.subr.mxu1 %v712_v33  ;;  %v412_v41 = vpop.f32.mrf.mxu0  ;;  %v539_v33 = vld [vmem:[#allocation3 + $0x1c0] sm:$0xff] }
 0x11f   : > { %920 = vmatpush1.msra.mxu1 %v711_v36  ;;  %906 = vmatprep.mubr.f32.mxu0 %v2143_v37  ;;  %v491_v36 = vld [vmem:[#allocation3 + $0x40] sm:$0xff]  ;;  %v488_v41 = vld [vmem:[#allocation3 + $0x28] sm:$0xff] }
 0x120   : > { %921 = vmatprep.subr.mxu1 %v709_v38  ;;  %907 = vmatmul.mubr.f32.vlgmr.msra.gmra.mxu0 %v2141_v34  ;;  %v413_v45 = vpop.f32.mrf.mxu0  ;;  %v763_v38 = vld [vmem:[#allocation3 + $0x8c0] sm:$0xff] }
 0x121   : > { %922 = vmatpush1.msra.mxu1 %v708_v39  ;;  %1524 = vmatpush3.msra.mxu0 %v530_v40  ;;  %v536_v39 = vld [vmem:[#allocation3 + $0x1a8] sm:$0xff]  ;;  %v762_v40 = vld [vmem:[#allocation3 + $0x8b8] sm:$0xff]  ;;  %v485_v45 = vld [vmem:[#allocation3 + $0x10] sm:$0xff] }
 0x122   : > { %923 = vmatprep.subr.mxu1 %v706_v42  ;;  %1525 = vmatprep.subr.mxu0 %v575_v43  ;;  %v2147_v50 = vpop.f32.mrf.mxu0  ;;  %v760_v42 = vld [vmem:[#allocation3 + $0x8a8] sm:$0xff]  ;;  %v533_v43 = vld [vmem:[#allocation3 + $0x190] sm:$0xff] }
 0x123   : > { %1048 = vmatprep.mubr.f32.mxu0 %v478_v23  ;;  %924 = vmatpush1.msra.mxu1 %v705_v44  ;;  %v676_v23 = vld [vmem:[#allocation3 + $0x608] sm:$0xff]  ;;  %v759_v44 = vld [vmem:[#allocation3 + $0x8a0] sm:$0xff] }
 0x124   : > { %1526 = vmatpush3.msra.mxu0 %v527_v46  ;;  %925 = vmatprep.subr.mxu1 %v703_v47  ;;  %v2149_v55 = vpop.f32.mrf.mxu0  ;;  %v757_v46 = vld [vmem:[#allocation3 + $0x890] sm:$0xff]  ;;  %v674_v47 = vld [vmem:[#allocation3 + $0x5f8] sm:$0xff] }
 0x125   : > { %1527 = vmatprep.subr.mxu0 %v572_v48  ;;  %926 = vmatpush1.msra.mxu1 %v702_v49  ;;  %v756_v48 = vld [vmem:[#allocation3 + $0x888] sm:$0xff]  ;;  %v626_v49 = vld [vmem:[#allocation3 + $0x478] sm:$0xff] }
 0x126   : > { %1528 = vmatpush3.msra.mxu0 %v524_v51  ;;  %927 = vmatprep.subr.mxu1 %v700_v52  ;;  %v453_v60 = vpop.f32.mrf.mxu0  ;;  %v754_v51 = vld [vmem:[#allocation3 + $0x878] sm:$0xff]  ;;  %v671_v52 = vld [vmem:[#allocation3 + $0x5e0] sm:$0xff] }
 0x127   : > { %1529 = vmatprep.subr.mxu0 %v569_v53  ;;  %928 = vmatpush1.msra.mxu1 %v699_v54  ;;  %v753_v53 = vld [vmem:[#allocation3 + $0x870] sm:$0xff]  ;;  %v623_v54 = vld [vmem:[#allocation3 + $0x460] sm:$0xff]  ;;  %v748_v60 = vld [vmem:[#allocation3 + $0x848] sm:$0xff] }
 0x128   : > { %1530 = vmatpush3.msra.mxu0 %v521_v56  ;;  %929 = vmatprep.subr.mxu1 %v697_v57  ;;  %v454_v1 = vpop.f32.mrf.mxu0  ;;  %v751_v56 = vld [vmem:[#allocation3 + $0x860] sm:$0xff]  ;;  %v668_v57 = vld [vmem:[#allocation3 + $0x5c8] sm:$0xff] }
 0x129   : > { %1531 = vmatprep.subr.mxu0 %v566_v58  ;;  %930 = vmatpush1.msra.mxu1 %v696_v59  ;;  %v750_v58 = vld [vmem:[#allocation3 + $0x858] sm:$0xff]  ;;  %v620_v59 = vld [vmem:[#allocation3 + $0x448] sm:$0xff] }
 0x12a   : > { %1532 = vmatpush3.msra.mxu0 %v518_v61  ;;  %931 = vmatprep.subr.mxu1 %v694_v62  ;;  %v665_v61 = vld [vmem:[#allocation3 + $0x5b0] sm:$0xff]  ;;  %v744_v1 = vld [vmem:[#allocation3 + $0x828] sm:$0xff] }
 0x12b   : > { %1533 = vmatprep.subr.mxu0 %v563_v63  ;;  %932 = vmatpush1.msra.mxu1 %v693_v0  ;;  %v617_v62 = vld [vmem:[#allocation3 + $0x430] sm:$0xff]  ;;  %v662_v0 = vld [vmem:[#allocation3 + $0x598] sm:$0xff] }
 0x12c   : > { %1534 = vmatpush3.msra.mxu0 %v515_v2  ;;  %933 = vmatprep.subr.mxu1 %v691_v3  ;;  %v745_v63 = vld [vmem:[#allocation3 + $0x830] sm:$0xff]  ;;  %v742_v2 = vld [vmem:[#allocation3 + $0x818] sm:$0xff]  ;;  %v659_v3 = vld [vmem:[#allocation3 + $0x580] sm:$0xff] }
 0x12d   : > { %1535 = vmatprep.subr.mxu0 %v560_v4  ;;  %934 = vmatpush1.msra.mxu1 %v690_v5  ;;  %v741_v4 = vld [vmem:[#allocation3 + $0x810] sm:$0xff]  ;;  %v611_v5 = vld [vmem:[#allocation3 + $0x400] sm:$0xff] }
 0x12e   : > { %1536 = vmatpush3.msra.mxu0 %v512_v6  ;;  %935 = vmatprep.subr.mxu1 %v688_v7  ;;  %v739_v6 = vld [vmem:[#allocation3 + $0x800] sm:$0xff]  ;;  %v656_v7 = vld [vmem:[#allocation3 + $0x568] sm:$0xff] }
 0x12f   : > { %1537 = vmatprep.subr.mxu0 %v557_v8  ;;  %936 = vmatpush1.msra.mxu1 %v687_v9  ;;  %v738_v8 = vld [vmem:[#allocation3 + $0x7f8] sm:$0xff]  ;;  %v608_v9 = vld [vmem:[#allocation3 + $0x3e8] sm:$0xff] }
 0x130   : > { %1538 = vmatpush3.msra.mxu0 %v509_v10  ;;  %937 = vmatprep.subr.mxu1 %v685_v11  ;;  %v736_v10 = vld [vmem:[#allocation3 + $0x7e8] sm:$0xff]  ;;  %v653_v11 = vld [vmem:[#allocation3 + $0x550] sm:$0xff] }
 0x131   : > { %1539 = vmatprep.subr.mxu0 %v554_v12  ;;  %938 = vmatpush1.msra.mxu1 %v684_v13  ;;  %v735_v12 = vld [vmem:[#allocation3 + $0x7e0] sm:$0xff]  ;;  %v605_v13 = vld [vmem:[#allocation3 + $0x3d0] sm:$0xff] }
 0x132   : > { %1540 = vmatpush3.msra.mxu0 %v506_v14  ;;  %939 = vmatprep.subr.mxu1 %v682_v15  ;;  %v733_v14 = vld [vmem:[#allocation3 + $0x7d0] sm:$0xff]  ;;  %v650_v15 = vld [vmem:[#allocation3 + $0x538] sm:$0xff] }
 0x133   : > { %1541 = vmatprep.subr.mxu0 %v551_v16  ;;  %940 = vmatpush1.msra.mxu1 %v681_v17  ;;  %v732_v16 = vld [vmem:[#allocation3 + $0x7c8] sm:$0xff]  ;;  %v602_v17 = vld [vmem:[#allocation3 + $0x3b8] sm:$0xff] }
 0x134   : > { %1542 = vmatpush3.msra.mxu0 %v503_v18  ;;  %941 = vmatprep.subr.mxu1 %v679_v19  ;;  %v730_v18 = vld [vmem:[#allocation3 + $0x7b8] sm:$0xff]  ;;  %v647_v19 = vld [vmem:[#allocation3 + $0x520] sm:$0xff] }
 0x135   : > { %1543 = vmatprep.subr.mxu0 %v548_v20  ;;  %942 = vmatpush1.msra.mxu1 %v678_v21  ;;  %v729_v20 = vld [vmem:[#allocation3 + $0x7b0] sm:$0xff]  ;;  %v599_v21 = vld [vmem:[#allocation3 + $0x3a0] sm:$0xff] }
 0x136   : > { %1544 = vmatpush3.msra.mxu0 %v500_v22  ;;  %943 = vmatprep.subr.mxu1 %v676_v23  ;;  %v727_v22 = vld [vmem:[#allocation3 + $0x7a0] sm:$0xff]  ;;  %v644_v23 = vld [vmem:[#allocation3 + $0x508] sm:$0xff] }
 0x137   : > { %1545 = vmatprep.subr.mxu0 %v545_v25  ;;  %944 = vmatpush1.msra.mxu1 %v675_v26  ;;  %v726_v25 = vld [vmem:[#allocation3 + $0x798] sm:$0xff]  ;;  %v482_v26 = vmul.f32 0.25, %v2149_v55 }
 0x138   : > { %1546 = vmatpush3.msra.mxu0 %v497_v27  ;;  %945 = vmatprep.subr.mxu1 %v769_v28  ;;  %v596_v27 = vld [vmem:[#allocation3 + $0x388] sm:$0xff]  ;;  %v770_v55 = vld [vmem:[#allocation3 + $0x8f8] sm:$0xff] }
 0x139   : > { %1547 = vmatprep.subr.mxu0 %v542_v29  ;;  %946 = vmatpush2.msra.mxu1 %v768_v30  ;;  %v724_v28 = vld [vmem:[#allocation3 + $0x788] sm:$0xff]  ;;  %v641_v29 = vld [vmem:[#allocation3 + $0x4f0] sm:$0xff]  ;;  %v723_v30 = vld [vmem:[#allocation3 + $0x780] sm:$0xff] }
 0x13a   : > { %1548 = vmatpush3.msra.mxu0 %v494_v31  ;;  %947 = vmatprep.subr.mxu1 %v766_v32  ;;  %v593_v31 = vld [vmem:[#allocation3 + $0x370] sm:$0xff]  ;;  %v638_v32 = vld [vmem:[#allocation3 + $0x4d8] sm:$0xff] }
 0x13b   : > { %1549 = vmatprep.subr.mxu0 %v539_v33  ;;  %948 = vmatpush2.msra.mxu1 %v765_v35  ;;  %v2155_v33 = vmul.f32 0.25, %v2147_v50  ;;  %v590_v35 = vld [vmem:[#allocation3 + $0x358] sm:$0xff]  ;;  %v632_v50 = vld [vmem:[#allocation3 + $0x4a8] sm:$0xff] }
 0x13c   : > { %1550 = vmatpush3.msra.mxu0 %v491_v36  ;;  %949 = vmatprep.subr.mxu1 %v763_v38  ;;  %v722_v36 = vld [vmem:[#allocation3 + $0x778] sm:$0xff]  ;;  %v635_v38 = vld [vmem:[#allocation3 + $0x4c0] sm:$0xff] }
 0x13d   : > { %1551 = vmatprep.subr.mxu0 %v536_v39  ;;  %950 = vmatpush2.msra.mxu1 %v762_v40  ;;  %v767_v39 = vld [vmem:[#allocation3 + $0x8e0] sm:$0xff] }
 0x13e   : > { %1552 = vmatpush3.msra.mxu0 %v488_v41  ;;  %951 = vmatprep.subr.mxu1 %v760_v42  ;;  %v587_v40 = vld [vmem:[#allocation3 + $0x340] sm:$0xff]  ;;  %v764_v42 = vld [vmem:[#allocation3 + $0x8c8] sm:$0xff] }
 0x13f   : > { %1553 = vmatprep.subr.mxu0 %v533_v43  ;;  %952 = vmatpush2.msra.mxu1 %v759_v44  ;;  %v719_v41 = vld [vmem:[#allocation3 + $0x760] sm:$0xff]  ;;  %v584_v43 = vld [vmem:[#allocation3 + $0x328] sm:$0xff] }
 0x140   : > { %1554 = vmatpush3.msra.mxu0 %v485_v45  ;;  %953 = vmatprep.subr.mxu1 %v757_v46  ;;  %v716_v44 = vld [vmem:[#allocation3 + $0x748] sm:$0xff]  ;;  %v629_v45 = vld [vmem:[#allocation3 + $0x490] sm:$0xff] }
 0x141   : > { %1049 = vmatmul.mubr.f32.vlgmr.msra.gmra.mxu0 %v2138_v24  ;;  %1558 = vmatprep.subr.mxu0 %v674_v47  ;;  %v747_v24 = vld [vmem:[#allocation3 + $0x840] sm:$0xff]  ;;  %v761_v46 = vld [vmem:[#allocation3 + $0x8b0] sm:$0xff] }
 0x142   : > { %954 = vmatpush2.msra.mxu1 %v756_v48  ;;  %1559 = vmatpush3.msra.mxu0 %v626_v49  ;;  %v581_v47 = vld [vmem:[#allocation3 + $0x310] sm:$0xff]  ;;  %v758_v49 = vld [vmem:[#allocation3 + $0x898] sm:$0xff] }
 0x143   : > { %1118 = vmatprep.mubr.f32.mxu0 %v2143_v37  ;;  %955 = vmatprep.subr.mxu1 %v754_v51  ;;  %v614_v37 = vld [vmem:[#allocation3 + $0x418] sm:$0xff]  ;;  %v713_v48 = vld [vmem:[#allocation3 + $0x730] sm:$0xff] }
 0x144   : > { %1560 = vmatprep.subr.mxu0 %v671_v52  ;;  %956 = vmatpush2.msra.mxu1 %v753_v53  ;;  %v710_v51 = vld [vmem:[#allocation3 + $0x718] sm:$0xff]  ;;  %v755_v52 = vld [vmem:[#allocation3 + $0x880] sm:$0xff] }
 0x145   : > { %1561 = vmatpush3.msra.mxu0 %v623_v54  ;;  %957 = vmatprep.subr.mxu1 %v751_v56  ;;  %v707_v53 = vld [vmem:[#allocation3 + $0x700] sm:$0xff]  ;;  %v1225_v54 = vld [vmem:[#allocation6 + $0xf8] sm:$0xff] }
 0x146   : > { %1562 = vmatprep.subr.mxu0 %v668_v57  ;;  %958 = vmatpush2.msra.mxu1 %v750_v58  ;;  %v1209_v56 = vld [vmem:[#allocation6 + $0x78] sm:$0xff]  ;;  %v752_v57 = vld [vmem:[#allocation3 + $0x868] sm:$0xff] }
 0x147   : > { %1563 = vmatpush3.msra.mxu0 %v620_v59  ;;  %959 = vmatprep.subr.mxu1 %v748_v60  ;;  %v704_v58 = vld [vmem:[#allocation3 + $0x6e8] sm:$0xff]  ;;  %v749_v59 = vld [vmem:[#allocation3 + $0x850] sm:$0xff] }
 0x148   : > { %1564 = vmatprep.subr.mxu0 %v665_v61  ;;  %960 = vmatpush2.msra.mxu1 %v747_v24  ;;  %v701_v60 = vld [vmem:[#allocation3 + $0x6d0] sm:$0xff]  ;;  %v746_v61 = vld [vmem:[#allocation3 + $0x838] sm:$0xff] }
 0x149   : > { %1565 = vmatpush3.msra.mxu0 %v617_v62  ;;  %961 = vmatprep.subr.mxu1 %v745_v63  ;;  %v698_v24 = vld [vmem:[#allocation3 + $0x6b8] sm:$0xff]  ;;  %v695_v62 = vld [vmem:[#allocation3 + $0x6a0] sm:$0xff]  ;;  %v740_v63 = vld [vmem:[#allocation3 + $0x808] sm:$0xff] }
 0x14a   : > { %1566 = vmatprep.subr.mxu0 %v662_v0  ;;  %962 = vmatpush2.msra.mxu1 %v744_v1  ;;  %v692_v0 = vld [vmem:[#allocation3 + $0x688] sm:$0xff]  ;;  %v737_v1 = vld [vmem:[#allocation3 + $0x7f0] sm:$0xff] }
 0x14b   : > { %1567 = vmatpush3.msra.mxu0 %v614_v37  ;;  %963 = vmatprep.subr.mxu1 %v742_v2  ;;  %v689_v37 = vld [vmem:[#allocation3 + $0x670] sm:$0xff]  ;;  %v734_v2 = vld [vmem:[#allocation3 + $0x7d8] sm:$0xff] }
 0x14c   : > { %1568 = vmatprep.subr.mxu0 %v659_v3  ;;  %964 = vmatpush2.msra.mxu1 %v741_v4  ;;  %v686_v3 = vld [vmem:[#allocation3 + $0x658] sm:$0xff]  ;;  %v731_v4 = vld [vmem:[#allocation3 + $0x7c0] sm:$0xff] }
 0x14d   : > { %1569 = vmatpush3.msra.mxu0 %v611_v5  ;;  %965 = vmatprep.subr.mxu1 %v739_v6  ;;  %v683_v5 = vld [vmem:[#allocation3 + $0x640] sm:$0xff]  ;;  %v728_v6 = vld [vmem:[#allocation3 + $0x7a8] sm:$0xff] }
 0x14e   : > { %1570 = vmatprep.subr.mxu0 %v656_v7  ;;  %966 = vmatpush2.msra.mxu1 %v738_v8  ;;  %v680_v7 = vld [vmem:[#allocation3 + $0x628] sm:$0xff]  ;;  %v725_v8 = vld [vmem:[#allocation3 + $0x790] sm:$0xff] }
 0x14f   : > { %1571 = vmatpush3.msra.mxu0 %v608_v9  ;;  %967 = vmatprep.subr.mxu1 %v736_v10  ;;  %v677_v9 = vld [vmem:[#allocation3 + $0x610] sm:$0xff] }
 0x150   : > { %1572 = vmatprep.subr.mxu0 %v653_v11  ;;  %968 = vmatpush2.msra.mxu1 %v735_v12  ;;  %v1224_v10 = vld [vmem:[#allocation6 + $0xf0] sm:$0xff]  ;;  %v1223_v12 = vld [vmem:[#allocation6 + $0xe8] sm:$0xff] }
 0x151   : > { %1573 = vmatpush3.msra.mxu0 %v605_v13  ;;  %969 = vmatprep.subr.mxu1 %v733_v14  ;;  %v1208_v11 = vld [vmem:[#allocation6 + $0x70] sm:$0xff]  ;;  %v1207_v13 = vld [vmem:[#allocation6 + $0x68] sm:$0xff]  ;;  %v1222_v14 = vld [vmem:[#allocation6 + $0xe0] sm:$0xff] }
 0x152   : > { %1574 = vmatprep.subr.mxu0 %v650_v15  ;;  %970 = vmatpush2.msra.mxu1 %v732_v16  ;;  %v1206_v15 = vld [vmem:[#allocation6 + $0x60] sm:$0xff]  ;;  %v1221_v16 = vld [vmem:[#allocation6 + $0xd8] sm:$0xff] }
 0x153   : > { %1575 = vmatpush3.msra.mxu0 %v602_v17  ;;  %971 = vmatprep.subr.mxu1 %v730_v18  ;;  %v1205_v17 = vld [vmem:[#allocation6 + $0x58] sm:$0xff]  ;;  %v1220_v18 = vld [vmem:[#allocation6 + $0xd0] sm:$0xff] }
 0x154   : > { %1576 = vmatprep.subr.mxu0 %v647_v19  ;;  %972 = vmatpush2.msra.mxu1 %v729_v20  ;;  %v1204_v19 = vld [vmem:[#allocation6 + $0x50] sm:$0xff]  ;;  %v1219_v20 = vld [vmem:[#allocation6 + $0xc8] sm:$0xff] }
 0x155   : > { %1577 = vmatpush3.msra.mxu0 %v599_v21  ;;  %973 = vmatprep.subr.mxu1 %v727_v22  ;;  %v1203_v21 = vld [vmem:[#allocation6 + $0x48] sm:$0xff]  ;;  %v1218_v22 = vld [vmem:[#allocation6 + $0xc0] sm:$0xff] }
 0x156   : > { %1578 = vmatprep.subr.mxu0 %v644_v23  ;;  %974 = vmatpush2.msra.mxu1 %v726_v25  ;;  %v1202_v23 = vld [vmem:[#allocation6 + $0x40] sm:$0xff]  ;;  %v1217_v25 = vld [vmem:[#allocation6 + $0xb8] sm:$0xff] }
 0x157   : > { %1579 = vmatpush3.msra.mxu0 %v596_v27  ;;  %975 = vmatprep.subr.mxu1 %v724_v28  ;;  %v1216_v27 = vld [vmem:[#allocation6 + $0xb0] sm:$0xff] }
 0x158   : > { %977 = vmatprep.mubr.f32.mxu1 %v482_v26  ;;  %1580 = vmatprep.subr.mxu0 %v641_v29  ;;  %v1200_v28 = vld [vmem:[#allocation6 + $0x30] sm:$0xff]  ;;  %v1215_v29 = vld [vmem:[#allocation6 + $0xa8] sm:$0xff] }
 0x159   : > { %976 = vmatpush2.msra.mxu1 %v723_v30  ;;  %1581 = vmatpush3.msra.mxu0 %v593_v31  ;;  %v1199_v30 = vld [vmem:[#allocation6 + $0x28] sm:$0xff]  ;;  %v1214_v31 = vld [vmem:[#allocation6 + $0xa0] sm:$0xff] }
 0x15a   : > { %978 = vmatmul.mubr.f32.vlgmr.msra.gmra.mxu1 %v2155_v33  ;;  %1582 = vmatprep.subr.mxu0 %v638_v32  ;;  %v1198_v32 = vld [vmem:[#allocation6 + $0x20] sm:$0xff] }
 0x15b   : > { %1593 = vmatprep.subr.mxu1 %v770_v55  ;;  %1583 = vmatpush3.msra.mxu0 %v590_v35  ;;  %v1197_v55 = vld [vmem:[#allocation6 + $0x18] sm:$0xff]  ;;  %v1212_v35 = vld [vmem:[#allocation6 + $0x90] sm:$0xff] }
 0x15c   : > { %1594 = vmatpush3.msra.mxu1 %v722_v36  ;;  %1188 = vmatprep.mubr.f32.mxu1 %v482_v26  ;;  %v1201_v26 = vld [vmem:[#allocation6 + $0x38] sm:$0xff]  ;;  %v1196_v36 = vld [vmem:[#allocation6 + $0x10] sm:$0xff] }
 0x15d   : > { %1584 = vmatprep.subr.mxu0 %v635_v38  ;;  %1595 = vmatprep.subr.mxu1 %v767_v39  ;;  %v1211_v38 = vld [vmem:[#allocation6 + $0x88] sm:$0xff] }
 0x15e   : > { %1585 = vmatpush3.msra.mxu0 %v587_v40  ;;  %1596 = vmatpush3.msra.mxu1 %v719_v41  ;;  %v1195_v39 = vld [vmem:[#allocation6 + $0x8] sm:$0xff]  ;;  %v1210_v40 = vld [vmem:[#allocation6 + $0x80] sm:$0xff] }
 0x15f   : > { %1586 = vmatprep.subr.mxu0 %v632_v50  ;;  %1597 = vmatprep.subr.mxu1 %v764_v42  ;;  %v1194_v41 = vld [vmem:[#allocation6] sm:$0xff]  ;;  %v1986_v50 = vmov 0.0   ;;  %v1241_v42 = vld [vmem:[#allocation6 + $0x178] sm:$0xff] }
 0x160   : > { %1587 = vmatpush3.msra.mxu0 %v584_v43  ;;  %1598 = vmatpush3.msra.mxu1 %v716_v44  ;;  %v1240_v43 = vld [vmem:[#allocation6 + $0x170] sm:$0xff]  ;;  %v1239_v44 = vld [vmem:[#allocation6 + $0x168] sm:$0xff] }
 0x161   : > { %1588 = vmatprep.subr.mxu0 %v629_v45  ;;  %1599 = vmatprep.subr.mxu1 %v761_v46  ;;  %v1238_v45 = vld [vmem:[#allocation6 + $0x160] sm:$0xff]  ;;  %v1237_v46 = vld [vmem:[#allocation6 + $0x158] sm:$0xff] }
 0x162   : > { %1589 = vmatpush3.msra.mxu0 %v581_v47  ;;  %1600 = vmatpush3.msra.mxu1 %v713_v48  ;;  %v1236_v47 = vld [vmem:[#allocation6 + $0x150] sm:$0xff]  ;;  %v1235_v48 = vld [vmem:[#allocation6 + $0x148] sm:$0xff] }
 0x163   : > { %1119 = vmatmul.mubr.f32.vlgmr.msra.gmra.mxu0 %v2141_v34  ;;  %1601 = vmatprep.subr.mxu1 %v758_v49  ;;  %v743_v34 = vld [vmem:[#allocation3 + $0x820] sm:$0xff] }
 0x164   : > { %1602 = vmatpush3.msra.mxu1 %v710_v51  ;;  %1628 = vmatprep.subr.mxu0 %v1225_v54  ;;  %v1234_v49 = vld [vmem:[#allocation6 + $0x140] sm:$0xff]  ;;  %v1233_v51 = vld [vmem:[#allocation6 + $0x138] sm:$0xff] }
 0x165   : > { %1603 = vmatprep.subr.mxu1 %v755_v52  ;;  %1629 = vmatpush3.msra.mxu0 %v1209_v56  ;;  %v1232_v52 = vld [vmem:[#allocation6 + $0x130] sm:$0xff]  ;;  %v1230_v54 = vld [vmem:[#allocation6 + $0x120] sm:$0xff]  ;;  %v1229_v56 = vld [vmem:[#allocation6 + $0x118] sm:$0xff] }
 0x166   : > { %1604 = vmatpush3.msra.mxu1 %v707_v53  ;;  %1630 = vmatprep.subr.mxu0 %v1224_v10  ;;  %v1231_v53 = vld [vmem:[#allocation6 + $0x128] sm:$0xff] }
 0x167   : > { %1605 = vmatprep.subr.mxu1 %v752_v57  ;;  %1631 = vmatpush3.msra.mxu0 %v1208_v11  ;;  %v1228_v57 = vld [vmem:[#allocation6 + $0x110] sm:$0xff] }
 0x168   : > { %1606 = vmatpush3.msra.mxu1 %v704_v58  ;;  %1632 = vmatprep.subr.mxu0 %v1223_v12  ;;  %v1227_v58 = vld [vmem:[#allocation6 + $0x108] sm:$0xff] }
 0x169   : > { %1607 = vmatprep.subr.mxu1 %v749_v59  ;;  %1633 = vmatpush3.msra.mxu0 %v1207_v13  ;;  %v1226_v59 = vld [vmem:[#allocation6 + $0x100] sm:$0xff] }
 0x16a   : > { %1608 = vmatpush3.msra.mxu1 %v701_v60  ;;  %1634 = vmatprep.subr.mxu0 %v1222_v14 }
 0x16b   : > { %1609 = vmatprep.subr.mxu1 %v746_v61  ;;  %1635 = vmatpush3.msra.mxu0 %v1206_v15 }
 0x16c   : > { %1610 = vmatpush3.msra.mxu1 %v698_v24  ;;  %1636 = vmatprep.subr.mxu0 %v1221_v16 }
 0x16d   : > { %1611 = vmatprep.subr.mxu1 %v743_v34  ;;  %1637 = vmatpush3.msra.mxu0 %v1205_v17 }
 0x16e   : > { %1612 = vmatpush3.msra.mxu1 %v695_v62  ;;  %1638 = vmatprep.subr.mxu0 %v1220_v18  ;;  %v1382_v18 = vld [vmem:[#allocation8] sm:$0x1] }
 0x16f   : > { %1613 = vmatprep.subr.mxu1 %v740_v63  ;;  %1639 = vmatpush3.msra.mxu0 %v1204_v19 }
 0x170   : > { %1614 = vmatpush3.msra.mxu1 %v692_v0  ;;  %1640 = vmatprep.subr.mxu0 %v1219_v20 }
 0x171   : > { %1615 = vmatprep.subr.mxu1 %v737_v1  ;;  %1641 = vmatpush3.msra.mxu0 %v1203_v21 }
 0x172   : > { %1616 = vmatpush3.msra.mxu1 %v689_v37  ;;  %1642 = vmatprep.subr.mxu0 %v1218_v22 }
 0x173   : > { %1617 = vmatprep.subr.mxu1 %v734_v2  ;;  %1643 = vmatpush3.msra.mxu0 %v1202_v23 }
 0x174   : > { %1618 = vmatpush3.msra.mxu1 %v686_v3  ;;  %1644 = vmatprep.subr.mxu0 %v1217_v25 }
 0x175   : > { %1619 = vmatprep.subr.mxu1 %v731_v4  ;;  %1645 = vmatpush3.msra.mxu0 %v1201_v26 }
 0x176   : > { %1620 = vmatpush3.msra.mxu1 %v683_v5  ;;  %1646 = vmatprep.subr.mxu0 %v1216_v27 }
 0x177   : > { %1621 = vmatprep.subr.mxu1 %v728_v6  ;;  %1647 = vmatpush3.msra.mxu0 %v1200_v28 }
 0x178   : > { %1622 = vmatpush3.msra.mxu1 %v680_v7  ;;  %1648 = vmatprep.subr.mxu0 %v1215_v29 }
 0x179   : > { %1623 = vmatprep.subr.mxu1 %v725_v8  ;;  %1649 = vmatpush3.msra.mxu0 %v1199_v30 }
 0x17a   : > { %1624 = vmatpush3.msra.mxu1 %v677_v9  ;;  %1650 = vmatprep.subr.mxu0 %v1214_v31 }
 0x17b   : > { %1189 = vmatmul.mubr.f32.vlgmr.msra.gmra.mxu1 %v2155_v33  ;;  %v1213_v33 = vld [vmem:[#allocation6 + $0x98] sm:$0xff]  ;;  %1651 = vmatpush3.msra.mxu0 %v1198_v32 }
 0x17c   : > { %1652 = vmatprep.subr.mxu0 %v1213_v33  ;;  %1680 = vmatprep.subr.mxu1 %v1986_v50 }
 0x17d   : > { %1653 = vmatpush3.msra.mxu0 %v1197_v55  ;;  %1681 = vmatpush3.msra.mxu1 %v1241_v42 }
 0x17e   : > { %1654 = vmatprep.subr.mxu0 %v1212_v35  ;;  %1682 = vmatprep.subr.mxu1 %v1986_v50 }
 0x17f   : > { %1655 = vmatpush3.msra.mxu0 %v1196_v36  ;;  %1683 = vmatpush3.msra.mxu1 %v1240_v43 }
 0x180   : > { %1656 = vmatprep.subr.mxu0 %v1211_v38  ;;  %1684 = vmatprep.subr.mxu1 %v1986_v50 }
 0x181   : > { %1657 = vmatpush3.msra.mxu0 %v1195_v39  ;;  %1685 = vmatpush3.msra.mxu1 %v1239_v44 }
 0x182   : > { %1658 = vmatprep.subr.mxu0 %v1210_v40  ;;  %1686 = vmatprep.subr.mxu1 %v1986_v50 }
 0x183   : > { %1659 = vmatpush3.msra.mxu0 %v1194_v41  ;;  %1687 = vmatpush3.msra.mxu1 %v1238_v45 }
 0x184   : > { %1688 = vmatprep.subr.mxu1 %v1986_v50  ;;  %1712 = vmatprep.mubr.msk.f32.mxu1 %vm1987_vm2, %v1986_v50 }
 0x185   : > { %1689 = vmatpush3.msra.mxu1 %v1237_v46 }
 0x186   : > { %1690 = vmatprep.subr.mxu1 %v1986_v50 }
 0x187   : > { %1691 = vmatpush3.msra.mxu1 %v1236_v47 }
 0x188   : > { %1692 = vmatprep.subr.mxu1 %v1986_v50 }
 0x189   : > { %1693 = vmatpush3.msra.mxu1 %v1235_v48 }
 0x18a   : > { %1694 = vmatprep.subr.mxu1 %v1986_v50 }
 0x18b   : > { %1695 = vmatpush3.msra.mxu1 %v1234_v49 }
 0x18c   : > { %1696 = vmatprep.subr.mxu1 %v1986_v50 }
 0x18d   : > { %1697 = vmatpush3.msra.mxu1 %v1233_v51 }
 0x18e   : > { %1698 = vmatprep.subr.mxu1 %v1986_v50 }
 0x18f   : > { %1699 = vmatpush3.msra.mxu1 %v1232_v52 }
 0x190   : > { %1700 = vmatprep.subr.mxu1 %v1986_v50 }
 0x191   : > { %1701 = vmatpush3.msra.mxu1 %v1231_v53 }
 0x192   : > { %1702 = vmatprep.subr.mxu1 %v1986_v50 }
 0x193   : > { %1703 = vmatpush3.msra.mxu1 %v1230_v54 }
 0x194   : > { %1704 = vmatprep.subr.mxu1 %v1986_v50 }
 0x195   : > { %1705 = vmatpush3.msra.mxu1 %v1229_v56 }
 0x196   : > { %1706 = vmatprep.subr.mxu1 %v1986_v50 }
 0x197   : > { %1707 = vmatpush3.msra.mxu1 %v1228_v57 }
 0x198   : > { %1708 = vmatprep.subr.mxu1 %v1986_v50 }
 0x199   : > { %1709 = vmatpush3.msra.mxu1 %v1227_v58 }
 0x19a   : > { %1710 = vmatprep.subr.mxu1 %v1986_v50 }
 0x19b   : > { %1711 = vmatpush3.msra.mxu1 %v1226_v59 }
 0x1d8   : > { %v837_v60 = vpop.f32.mrf.mxu1 }
 0x1da   : > { %v839_v24 = vpop.f32.mrf.mxu1 }
 0x1e0   : > { %v908_v61 = vpop.f32.mrf.mxu0 }
 0x1e1   : > { %v909_v0 = vadd.f32 %v908_v61, %v837_v60 }
 0x1e2   : > { %v910_v34 = vpop.f32.mrf.mxu0 }
 0x1e3   : > { %v911_v63 = vadd.f32 %v910_v34, %v839_v24 }
 0x201   : > { %v1555_v3 = vpop.f32.mrf.mxu0 }
 0x203   : > { %v1556_v4 = vpop.f32.mrf.mxu0 }
 0x204   : > { %v1557_v9 = vadd.f32 %v1556_v4, %v1555_v3 }
 0x21a   : > { %v979_v62 = vpop.f32.mrf.mxu1 }
 0x21b   : > { %v980_v2 = vadd.f32 %v979_v62, %v909_v0 }
 0x21c   : > { %v981_v1 = vpop.f32.mrf.mxu1 }
 0x21d   : > { %v982_v37 = vadd.f32 %v981_v1, %v911_v63 }
 0x21f   : > { %1306 = vmatprep.mubr.f32.mxu0 %v982_v37 }
 0x220   : > { %1307 = vmatmul.mubr.f32.vlgmr.msra.gmra.mxu0 %v980_v2 }
 0x223   : > { %v1590_v5 = vpop.f32.mrf.mxu0 }
 0x225   : > { %v1591_v6 = vpop.f32.mrf.mxu0 }
 0x226   : > { %v1592_v7 = vadd.f32 %v1591_v6, %v1590_v5 }
 0x228   : > { %v1121_v11 = vadd.f32 %v1592_v7, %v1557_v9 }
 0x23b   : > { %v1625_v8 = vpop.f32.mrf.mxu1 }
 0x23d   : > { %v1626_v10 = vpop.f32.mrf.mxu1 }
 0x23e   : > { %v1627_v12 = vadd.f32 %v1626_v10, %v1625_v8 }
 0x240   : > { %v1191_v13 = vadd.f32 %v1627_v12, %v1121_v11 }
 0x242   : > { %1713 = vmatmul.mubr.f32.vlgmr.msra.gmra.mxu1 %v1191_v13 }
 0x2e0   : > { %v1660_v14 = vpop.f32.mrf.mxu0 }
 0x2e2   : > { %v1661_v15 = vpop.f32.mrf.mxu0 }
 0x2e3   : > { %v1662_v16 = vadd.f32 %v1661_v15, %v1660_v14 }
 0x302   : > { %v1378_v17 = vpop.f32.mrf.mxu1 }
 0x303   : > { %v1379_v19 = vadd.f32 %v1662_v16, %v1378_v17 }
 0x304   : > { %v1714_v20 = vpop.f32.mrf.mxu1 }
 0x305   : > { %v1383_v21 = vadd.f32 %v1382_v18, %v1379_v19 }
 0x307   : > { %1384 = vst [vmem:[%s253_s24] sm:$0x1] %v1383_v21 }
 0x308   : > { %1903 = shalt.err (!%p1900_p9)
}
 0x309   : > { %s1904_s29 = scalar_lea.hbm %s1396_s8, 16  ;;  %s1908_s14 = scalar_lea.hbm %s2203_s4, 32 }
 0x30a   : > { %p1905_p8 = scmp.ne.s32.totalorder %s1396_s8, %s1904_s29  ;;  %p1909_p2 = scmp.lt.s32.totalorder %s1396_s8, %s2203_s4 }
 0x30b   : > { %p1910_p5 = scmp.lt.s32.totalorder %s1908_s14, %s1904_s29 }
 0x30c   : > { %p1906_p12 = pnand %p1905_p8, %p2054_p4 }
 0x30d   : > { %p1911_p0 = por %p1910_p5, %p1909_p2 }
 0x30e   : > { %p1907_p1 = pneg %p1906_p12 }
 0x310   : > { %p1912_p10 = pnand %p1911_p0, %p1907_p1 }
 0x312   : > { %1915 = shalt.err (!%p1912_p10)
}
 0x313   : > { %1728 = dma.vmem_to_hbm [thread:$0]  (%p2054_p4), %s1399_s26, 16, %s1396_s8, %s1386_s10  }
 0x314 PF: > { %p1750_p11 = scmp.ge.s32.totalorder %s1974_s20, 2  ;;  %s1410_s22 = sand.u32 1, %s1954_s15  }
 0x315   : > { %p2209_p13 = scmp.ne.s32.totalorder %s2205_s27, 0  ;;  %s1411_s24 = scalar_lea.sflag [#allocation5], %s1410_s22 }
 0x317   : > { %p1741_p3 = pnand %p1750_p11, %p2209_p13 }
 0x319   : > { %p1742_p6 = pneg %p1741_p3 }
 0x31b   : > { %1949 = dma.done.wait (%p1742_p6), %s1411_s24, 16  }
 0x31c   : > { %1951 = vsyncadd (%p1742_p6), %s1411_s24, 4294967280  ;;  %s19_s20 = sadd.s32 1, %s1974_s20   ;;  %s2210_s15 = smov %s1958_s16 }
 0x31d   : > { %p16_p7 = scmp.ge.s32.totalorder %s19_s20, 4   ;;  %s2211_s16 = smov %s1962_s17 }
 0x31e   : > { %s2212_s17 = smov %s2067_s28  ;;  %s2213_s18 = smov %s1970_s19 }
 0x31f   : > { %s2214_s19 = smov %s2216_s23  ;;  %18 = sbr.rel (!%p16_p7) target bundleno = 6 (0x6), region = 92 }
 0x324   :  { %1415 = vsyncpa [#allocation4], 1 }
 0x325   :  { %1417 = vsyncpa [#allocation4 + $0x1], 1 }
 0x326   :  { %1418 = vsyncpa [#allocation7], 1 }
 0x327   :  { %1419 = vsyncpa [#allocation5], 1 }
 0x328   :  { %1421 = vsyncpa [#allocation5 + $0x1], 1 }

</bundles_post_ra>
